<compile_context>
chip_gen: v7x
topology: tpu7x:2x2x1
jax: 0.10.0
libtpu: 0.0.40
codegen_flags: <defaults>
</compile_context>

<pallas_src>
import numpy as np
import jax
import jax.numpy as jnp
from jax.experimental import pallas as pl
from jax.experimental.pallas import tpu as pltpu

N_QUAD = 16     # number of Gauss-Laguerre quadrature nodes (the "n" of BernsteinNN)
HIDDEN = 32     # hidden width of the concrete `func` MLP (1 -> H -> H -> 1, ELU)
T_TOTAL = 256   # number of time points in the demo input
PW = HIDDEN + 11        # packed-param width: [ w2 (H) | b2 (1) | w1 (1) | b1 (1) | w3blk (8) ]
NS = 2 * N_QUAD + 3     # SMEM scalars: [ nodes (16) | wq (16) | b3 | scale_raw | offset_raw ]


def roots_laguerre(n):
    """Gauss-Laguerre nodes/weights via Golub-Welsch (stand-in for scipy.special.roots_laguerre)."""
    i = np.arange(n, dtype=np.float64)
    diag = 2.0 * i + 1.0
    off = np.arange(1, n, dtype=np.float64)
    jac = np.diag(diag) + np.diag(off, 1) + np.diag(off, -1)
    x, v = np.linalg.eigh(jac)
    w = v[0, :] ** 2            # mu0 = int_0^inf exp(-x) dx = 1
    return x, w


def elu(x):
    # ELU with the negative branch clamped so exp() never overflows in the unused branch.
    return jnp.where(x > 0, x, jnp.exp(jnp.minimum(x, 0.0)) - 1.0)


def bernstein_kernel(t_ref, params_ref, sc_ref, out_ref):
    tb = t_ref.shape[1]                              # time lanes in this block
    t = t_ref[...]                                   # (1, TB)
    inv_t = 1.0 / t                                  # hoisted: ONE divide per block

    # Packed weights, single DMA: columns [ w2 | b2 | w1 | b1 | w3blk ].
    params = params_ref[...]                         # (H, H+11)
    w2 = params[:, 0:HIDDEN]                         # (H, H)
    b2 = params[:, HIDDEN:HIDDEN + 1]                # (H, 1)
    w1a = params[:, HIDDEN + 1:HIDDEN + 3]           # (H, 2) = [w1 | b1]
    w3blk = params[:, HIDDEN + 3:HIDDEN + 11]        # (H, 8), col 0 = w3, cols 1..7 = 0

    # Build x on the lane axis in-kernel from SMEM node scalars (no host-replicated array).
    # x[0, j*TB + k] = nodes[j] / t[k]  -- all quadrature nodes batched on the lane axis.
    x = jnp.concatenate([sc_ref[j] * inv_t for j in range(N_QUAD)], axis=1)   # (1, L)
    xaug = jnp.concatenate([x, jnp.ones_like(x)], axis=0)                     # (2, L) = [x; 1]

    # Layer 1 on the MXU: z1 = [w1|b1] @ [x; 1]   (removes w1*x and +b1 from the VPU).
    h1 = elu(jnp.dot(w1a, xaug, preferred_element_type=jnp.float32))          # (H, L)
    # Layer 2: one wide (H,H)x(H,L) MXU matmul; the b2 add stays on the VPU.
    h2 = elu(jnp.dot(w2, h1, preferred_element_type=jnp.float32) + b2)        # (H, L)

    # Output contraction on the MXU: contract over H (lhs-transposed); row 0 = w3^T @ h2.
    fmat = jax.lax.dot_general(w3blk, h2, (((0,), (0,)), ((), ())),
                               preferred_element_type=jnp.float32)            # (8, L)
    b3 = sc_ref[2 * N_QUAD]
    f = jnp.abs(fmat[0:1, :] + b3)                                            # (1, L)

    # Quadrature: 16 scalar-weighted adds with wq read from SMEM.
    y = sc_ref[N_QUAD] * f[:, 0:tb]
    for j in range(1, N_QUAD):
        y = y + sc_ref[N_QUAD + j] * f[:, j * tb:(j + 1) * tb]                # (1, TB)

    scale = jnp.maximum(sc_ref[2 * N_QUAD + 1], 0.0)    # relu(_scale)
    offset = jnp.maximum(sc_ref[2 * N_QUAD + 2], 0.0)   # relu(_offset)
    out_ref[...] = scale * (y * inv_t) + offset


def pack_bernstein_params(nodes, wq, w1, b1, w2, b2, w3, b3, scale_raw, offset_raw):
    """Host-side packing, done ONCE (hoisted out of the per-call hot path)."""
    H = HIDDEN
    w1a = jnp.concatenate([w1.reshape(H, 1), b1.reshape(H, 1)], axis=1)           # (H, 2)
    w3blk = jnp.concatenate([w3.reshape(H, 1), jnp.zeros((H, 7), jnp.float32)],
                            axis=1)                                               # (H, 8)
    params = jnp.concatenate(
        [w2.astype(jnp.float32),
         b2.reshape(H, 1).astype(jnp.float32),
         w1a.astype(jnp.float32),
         w3blk.astype(jnp.float32)],
        axis=1)                                                                   # (H, H+11)
    scalars = jnp.concatenate(
        [nodes.reshape(-1).astype(jnp.float32),
         wq.reshape(-1).astype(jnp.float32),
         jnp.array([b3, scale_raw, offset_raw], dtype=jnp.float32)])              # (2n+3,)
    return params, scalars


def _pick_t_blk(T):
    # Prefer a multi-step grid (>=2 steps) so v7x's 2 TensorCores both get work,
    # capped at 512 lanes: keeps the (H, N_QUAD*t_blk) f32 slabs (~1 MiB each)
    # far inside even v5e's 16 MiB scoped-VMEM default, and measured data shows
    # ~512-lane blocks already sit near the roofline.
    if T % 128 != 0 or T == 128:
        return T                      # single full-array block
    for cand in (512, 384, 256, 128):
        if T % cand == 0 and T // cand >= 2:
            return cand
    return T


def bernstein_forward_pallas(t, params, scalars, t_blk=None):
    T = t.shape[0]
    if t_blk is None:
        t_blk = _pick_t_blk(T)
    assert T % t_blk == 0 and (t_blk % 128 == 0 or t_blk == T), \
        "demo assumes lane-aligned (or full-axis) time tiles"

    t2 = t.reshape(1, T).astype(jnp.float32)
    out = pl.pallas_call(
        bernstein_kernel,
        out_shape=jax.ShapeDtypeStruct((1, T), jnp.float32),
        grid=(T // t_blk,),
        in_specs=[
            pl.BlockSpec((1, t_blk), lambda i: (0, i)),                  # t
            pl.BlockSpec((HIDDEN, PW), lambda i: (0, 0)),                # packed MLP weights
            pl.BlockSpec((NS,), lambda i: (0,),
                         memory_space=pltpu.MemorySpace.SMEM),           # nodes|wq|b3|scale|offset
        ],
        out_specs=pl.BlockSpec((1, t_blk), lambda i: (0, i)),
        compiler_params=pltpu.CompilerParams(dimension_semantics=("parallel",)),
    )(t2, params, scalars)
    return out.reshape(T)


def reference_forward(t, nodes, wq, w1, b1, w2, b2, w3, b3, scale_raw, offset_raw):
    """Pure-JAX mirror of BernsteinNN.forward (also used to replicate _initalize_scale)."""
    t = t.reshape(-1)                              # (T,)
    x = nodes.reshape(-1, 1) / t[None, :]          # (n, T)
    xf = x.reshape(-1, 1)                          # (n*T, 1)
    h = elu(xf @ w1.T + b1[None, :])               # (n*T, H)
    h = elu(h @ w2.T + b2[None, :])                # (n*T, H)
    f = jnp.abs(h @ w3.T + b3)                     # (n*T, 1)
    f = f.reshape(x.shape)                         # (n, T)
    y = f.T @ wq                                   # (T,)
    return jnp.maximum(scale_raw, 0.0) * (y / t) + jnp.maximum(offset_raw, 0.0)


if __name__ == "__main__":
    # Quadrature buffers (float32, as in the torch module).
    x_np, w_np = roots_laguerre(N_QUAD)
    nodes = jnp.asarray(x_np, dtype=jnp.float32)
    wq = jnp.asarray(w_np, dtype=jnp.float32)

    # Deterministic init of the concrete `func` MLP (1 -> H -> H -> 1, ELU), Linear-style uniform init.
    key = jax.random.PRNGKey(0)
    k1, k2, k3, k4, k5, k6, k7 = jax.random.split(key, 7)
    lim1 = 1.0
    limh = 1.0 / float(np.sqrt(HIDDEN))
    w1 = jax.random.uniform(k1, (HIDDEN, 1), jnp.float32, -lim1, lim1)
    b1 = jax.random.uniform(k2, (HIDDEN,), jnp.float32, -lim1, lim1)
    w2 = jax.random.uniform(k3, (HIDDEN, HIDDEN), jnp.float32, -limh, limh)
    b2 = jax.random.uniform(k4, (HIDDEN,), jnp.float32, -limh, limh)
    w3 = jax.random.uniform(k5, (1, HIDDEN), jnp.float32, -limh, limh)
    b3 = float(jax.random.uniform(k6, (), jnp.float32, -limh, limh))

    # Replicate BernsteinNN._initalize_scale(t0=1e-3): _scale = 1 / forward(t0) with scale=1, offset=0.
    t0 = jnp.array([1e-3], dtype=jnp.float32)
    y0 = reference_forward(t0, nodes, wq, w1, b1, w2, b2, w3, b3, 1.0, 0.0)[0]
    scale_raw = float(1.0 / y0)
    offset_raw = 0.0

    # Pack weights ONCE (hoisted); the jitted forward only reshapes t and launches the kernel.
    params, scalars = pack_bernstein_params(nodes, wq, w1, b1, w2, b2, w3, b3,
                                            scale_raw, offset_raw)
    fwd = jax.jit(bernstein_forward_pallas, static_argnames=("t_blk",))
    # TODO(synk): for optimization loops over many t vectors, stack them on the lane
    #             axis and amortize the launch cost across the batch.

    # Demo input: positive time points (module assumes t > 0; no guard against t == 0).
    t = jax.random.uniform(k7, (T_TOTAL,), jnp.float32, 0.1, 10.0)

    out = jax.block_until_ready(fwd(t, params, scalars))

    ref = jax.block_until_ready(
        reference_forward(t, nodes, wq, w1, b1, w2, b2, w3, b3, scale_raw, offset_raw))
    np.testing.assert_allclose(np.asarray(out), np.asarray(ref), rtol=3e-3, atol=1e-12)

    print("KERNEL_OK")
</pallas_src>

<mosaic_0001>
module attributes {stable_mosaic.version = 11 : i64} {
  func.func @bernstein_kernel(%arg0: i32, %arg1: memref<1x128xf32, #tpu.memory_space<vmem>>, %arg2: memref<32x43xf32, #tpu.memory_space<vmem>>, %arg3: memref<35xf32, #tpu.memory_space<smem>>, %arg4: memref<1x128xf32, #tpu.memory_space<vmem>>) attributes {dimension_semantics = [#tpu.dimension_semantics<parallel>], iteration_bounds = array<i64: 2>, scalar_prefetch = 0 : i64, scratch_operands = 0 : i64, tpu.core_type = #tpu.core_type<tc>, window_params = [{transform_indices = @transform_0, window_bounds = array<i64: 1, 128>}, {pipeline_mode = #tpu.pipeline_mode<synchronous>, transform_indices = @transform_1, window_bounds = array<i64: 32, 43>}, {transform_indices = @transform_2, window_bounds = array<i64: 35>}, {transform_indices = @transform_3, window_bounds = array<i64: 1, 128>}]} {
    %c0 = arith.constant 0 : index
    %c0_0 = arith.constant 0 : index
    %0 = vector.load %arg1[%c0, %c0_0] : memref<1x128xf32, #tpu.memory_space<vmem>>, vector<1x128xf32>
    %cst = arith.constant 1.000000e+00 : f32
    %1 = vector.broadcast %cst : f32 to vector<1x128xf32>
    %2 = arith.divf %1, %0 : vector<1x128xf32>
    %c0_1 = arith.constant 0 : index
    %c0_2 = arith.constant 0 : index
    %3 = vector.load %arg2[%c0_1, %c0_2] : memref<32x43xf32, #tpu.memory_space<vmem>>, vector<32x43xf32>
    %4 = vector.extract_strided_slice %3 {offsets = [0, 0], sizes = [32, 32], strides = [1, 1]} : vector<32x43xf32> to vector<32x32xf32>
    %5 = vector.extract_strided_slice %3 {offsets = [0, 32], sizes = [32, 1], strides = [1, 1]} : vector<32x43xf32> to vector<32x1xf32>
    %6 = vector.extract_strided_slice %3 {offsets = [0, 33], sizes = [32, 2], strides = [1, 1]} : vector<32x43xf32> to vector<32x2xf32>
    %7 = vector.extract_strided_slice %3 {offsets = [0, 35], sizes = [32, 8], strides = [1, 1]} : vector<32x43xf32> to vector<32x8xf32>
    %c0_3 = arith.constant 0 : index
    %8 = memref.load %arg3[%c0_3] : memref<35xf32, #tpu.memory_space<smem>>
    %9 = vector.broadcast %8 : f32 to vector<1x128xf32>
    %10 = arith.mulf %9, %2 : vector<1x128xf32>
    %c1 = arith.constant 1 : index
    %11 = memref.load %arg3[%c1] : memref<35xf32, #tpu.memory_space<smem>>
    %12 = vector.broadcast %11 : f32 to vector<1x128xf32>
    %13 = arith.mulf %12, %2 : vector<1x128xf32>
    %c2 = arith.constant 2 : index
    %14 = memref.load %arg3[%c2] : memref<35xf32, #tpu.memory_space<smem>>
    %15 = vector.broadcast %14 : f32 to vector<1x128xf32>
    %16 = arith.mulf %15, %2 : vector<1x128xf32>
    %c3 = arith.constant 3 : index
    %17 = memref.load %arg3[%c3] : memref<35xf32, #tpu.memory_space<smem>>
    %18 = vector.broadcast %17 : f32 to vector<1x128xf32>
    %19 = arith.mulf %18, %2 : vector<1x128xf32>
    %c4 = arith.constant 4 : index
    %20 = memref.load %arg3[%c4] : memref<35xf32, #tpu.memory_space<smem>>
    %21 = vector.broadcast %20 : f32 to vector<1x128xf32>
    %22 = arith.mulf %21, %2 : vector<1x128xf32>
    %c5 = arith.constant 5 : index
    %23 = memref.load %arg3[%c5] : memref<35xf32, #tpu.memory_space<smem>>
    %24 = vector.broadcast %23 : f32 to vector<1x128xf32>
    %25 = arith.mulf %24, %2 : vector<1x128xf32>
    %c6 = arith.constant 6 : index
    %26 = memref.load %arg3[%c6] : memref<35xf32, #tpu.memory_space<smem>>
    %27 = vector.broadcast %26 : f32 to vector<1x128xf32>
    %28 = arith.mulf %27, %2 : vector<1x128xf32>
    %c7 = arith.constant 7 : index
    %29 = memref.load %arg3[%c7] : memref<35xf32, #tpu.memory_space<smem>>
    %30 = vector.broadcast %29 : f32 to vector<1x128xf32>
    %31 = arith.mulf %30, %2 : vector<1x128xf32>
    %c8 = arith.constant 8 : index
    %32 = memref.load %arg3[%c8] : memref<35xf32, #tpu.memory_space<smem>>
    %33 = vector.broadcast %32 : f32 to vector<1x128xf32>
    %34 = arith.mulf %33, %2 : vector<1x128xf32>
    %c9 = arith.constant 9 : index
    %35 = memref.load %arg3[%c9] : memref<35xf32, #tpu.memory_space<smem>>
    %36 = vector.broadcast %35 : f32 to vector<1x128xf32>
    %37 = arith.mulf %36, %2 : vector<1x128xf32>
    %c10 = arith.constant 10 : index
    %38 = memref.load %arg3[%c10] : memref<35xf32, #tpu.memory_space<smem>>
    %39 = vector.broadcast %38 : f32 to vector<1x128xf32>
    %40 = arith.mulf %39, %2 : vector<1x128xf32>
    %c11 = arith.constant 11 : index
    %41 = memref.load %arg3[%c11] : memref<35xf32, #tpu.memory_space<smem>>
    %42 = vector.broadcast %41 : f32 to vector<1x128xf32>
    %43 = arith.mulf %42, %2 : vector<1x128xf32>
    %c12 = arith.constant 12 : index
    %44 = memref.load %arg3[%c12] : memref<35xf32, #tpu.memory_space<smem>>
    %45 = vector.broadcast %44 : f32 to vector<1x128xf32>
    %46 = arith.mulf %45, %2 : vector<1x128xf32>
    %c13 = arith.constant 13 : index
    %47 = memref.load %arg3[%c13] : memref<35xf32, #tpu.memory_space<smem>>
    %48 = vector.broadcast %47 : f32 to vector<1x128xf32>
    %49 = arith.mulf %48, %2 : vector<1x128xf32>
    %c14 = arith.constant 14 : index
    %50 = memref.load %arg3[%c14] : memref<35xf32, #tpu.memory_space<smem>>
    %51 = vector.broadcast %50 : f32 to vector<1x128xf32>
    %52 = arith.mulf %51, %2 : vector<1x128xf32>
    %c15 = arith.constant 15 : index
    %53 = memref.load %arg3[%c15] : memref<35xf32, #tpu.memory_space<smem>>
    %54 = vector.broadcast %53 : f32 to vector<1x128xf32>
    %55 = arith.mulf %54, %2 : vector<1x128xf32>
    %56 = tpu.concatenate %10, %13, %16, %19, %22, %25, %28, %31, %34, %37, %40, %43, %46, %49, %52, %55 in 1 : vector<1x128xf32>, vector<1x128xf32>, vector<1x128xf32>, vector<1x128xf32>, vector<1x128xf32>, vector<1x128xf32>, vector<1x128xf32>, vector<1x128xf32>, vector<1x128xf32>, vector<1x128xf32>, vector<1x128xf32>, vector<1x128xf32>, vector<1x128xf32>, vector<1x128xf32>, vector<1x128xf32>, vector<1x128xf32> -> vector<1x2048xf32>
    %cst_4 = arith.constant 1.000000e+00 : f32
    %57 = vector.broadcast %cst_4 : f32 to vector<1x2048xf32>
    %58 = tpu.concatenate %56, %57 in 0 : vector<1x2048xf32>, vector<1x2048xf32> -> vector<2x2048xf32>
    %cst_5 = arith.constant dense<0.000000e+00> : vector<32x2048xf32>
    %59 = tpu.matmul %6, %58, %cst_5 {dimension_numbers = #tpu.dot_dimension_numbers<[1], [0], [0], [1], [0, 0, 1, 1], [], []>} : vector<32x2xf32>, vector<2x2048xf32>, vector<32x2048xf32> -> vector<32x2048xf32>
    %cst_6 = arith.constant 0.000000e+00 : f32
    %60 = vector.broadcast %cst_6 : f32 to vector<32x2048xf32>
    %61 = arith.cmpf ogt, %59, %60 : vector<32x2048xf32>
    %cst_7 = arith.constant 0.000000e+00 : f32
    %62 = vector.broadcast %cst_7 : f32 to vector<32x2048xf32>
    %63 = arith.minimumf %59, %62 : vector<32x2048xf32>
    %64 = math.exp %63 : vector<32x2048xf32>
    %cst_8 = arith.constant 1.000000e+00 : f32
    %65 = vector.broadcast %cst_8 : f32 to vector<32x2048xf32>
    %66 = arith.subf %64, %65 : vector<32x2048xf32>
    %67 = arith.select %61, %59, %66 : vector<32x2048xi1>, vector<32x2048xf32>
    %cst_9 = arith.constant dense<0.000000e+00> : vector<32x2048xf32>
    %68 = tpu.matmul %4, %67, %cst_9 {dimension_numbers = #tpu.dot_dimension_numbers<[1], [0], [0], [1], [0, 0, 1, 1], [], []>} : vector<32x32xf32>, vector<32x2048xf32>, vector<32x2048xf32> -> vector<32x2048xf32>
    %69 = vector.broadcast %5 : vector<32x1xf32> to vector<32x2048xf32>
    %70 = arith.addf %68, %69 : vector<32x2048xf32>
    %cst_10 = arith.constant 0.000000e+00 : f32
    %71 = vector.broadcast %cst_10 : f32 to vector<32x2048xf32>
    %72 = arith.cmpf ogt, %70, %71 : vector<32x2048xf32>
    %cst_11 = arith.constant 0.000000e+00 : f32
    %73 = vector.broadcast %cst_11 : f32 to vector<32x2048xf32>
    %74 = arith.minimumf %70, %73 : vector<32x2048xf32>
    %75 = math.exp %74 : vector<32x2048xf32>
    %cst_12 = arith.constant 1.000000e+00 : f32
    %76 = vector.broadcast %cst_12 : f32 to vector<32x2048xf32>
    %77 = arith.subf %75, %76 : vector<32x2048xf32>
    %78 = arith.select %72, %70, %77 : vector<32x2048xi1>, vector<32x2048xf32>
    %cst_13 = arith.constant dense<0.000000e+00> : vector<8x2048xf32>
    %79 = tpu.matmul %7, %78, %cst_13 {dimension_numbers = #tpu.dot_dimension_numbers<[0], [0], [1], [1], [0, 1, 1, 1], [], []>} : vector<32x8xf32>, vector<32x2048xf32>, vector<8x2048xf32> -> vector<8x2048xf32>
    %c32 = arith.constant 32 : index
    %80 = memref.load %arg3[%c32] : memref<35xf32, #tpu.memory_space<smem>>
    %81 = vector.extract_strided_slice %79 {offsets = [0, 0], sizes = [1, 2048], strides = [1, 1]} : vector<8x2048xf32> to vector<1x2048xf32>
    %82 = vector.broadcast %80 : f32 to vector<1x2048xf32>
    %83 = arith.addf %81, %82 : vector<1x2048xf32>
    %84 = math.absf %83 : vector<1x2048xf32>
    %c16 = arith.constant 16 : index
    %85 = memref.load %arg3[%c16] : memref<35xf32, #tpu.memory_space<smem>>
    %86 = vector.extract_strided_slice %84 {offsets = [0, 0], sizes = [1, 128], strides = [1, 1]} : vector<1x2048xf32> to vector<1x128xf32>
    %87 = vector.broadcast %85 : f32 to vector<1x128xf32>
    %88 = arith.mulf %87, %86 : vector<1x128xf32>
    %c17 = arith.constant 17 : index
    %89 = memref.load %arg3[%c17] : memref<35xf32, #tpu.memory_space<smem>>
    %90 = vector.extract_strided_slice %84 {offsets = [0, 128], sizes = [1, 128], strides = [1, 1]} : vector<1x2048xf32> to vector<1x128xf32>
    %91 = vector.broadcast %89 : f32 to vector<1x128xf32>
    %92 = arith.mulf %91, %90 : vector<1x128xf32>
    %93 = arith.addf %88, %92 : vector<1x128xf32>
    %c18 = arith.constant 18 : index
    %94 = memref.load %arg3[%c18] : memref<35xf32, #tpu.memory_space<smem>>
    %95 = vector.extract_strided_slice %84 {offsets = [0, 256], sizes = [1, 128], strides = [1, 1]} : vector<1x2048xf32> to vector<1x128xf32>
    %96 = vector.broadcast %94 : f32 to vector<1x128xf32>
    %97 = arith.mulf %96, %95 : vector<1x128xf32>
    %98 = arith.addf %93, %97 : vector<1x128xf32>
    %c19 = arith.constant 19 : index
    %99 = memref.load %arg3[%c19] : memref<35xf32, #tpu.memory_space<smem>>
    %100 = vector.extract_strided_slice %84 {offsets = [0, 384], sizes = [1, 128], strides = [1, 1]} : vector<1x2048xf32> to vector<1x128xf32>
    %101 = vector.broadcast %99 : f32 to vector<1x128xf32>
    %102 = arith.mulf %101, %100 : vector<1x128xf32>
    %103 = arith.addf %98, %102 : vector<1x128xf32>
    %c20 = arith.constant 20 : index
    %104 = memref.load %arg3[%c20] : memref<35xf32, #tpu.memory_space<smem>>
    %105 = vector.extract_strided_slice %84 {offsets = [0, 512], sizes = [1, 128], strides = [1, 1]} : vector<1x2048xf32> to vector<1x128xf32>
    %106 = vector.broadcast %104 : f32 to vector<1x128xf32>
    %107 = arith.mulf %106, %105 : vector<1x128xf32>
    %108 = arith.addf %103, %107 : vector<1x128xf32>
    %c21 = arith.constant 21 : index
    %109 = memref.load %arg3[%c21] : memref<35xf32, #tpu.memory_space<smem>>
    %110 = vector.extract_strided_slice %84 {offsets = [0, 640], sizes = [1, 128], strides = [1, 1]} : vector<1x2048xf32> to vector<1x128xf32>
    %111 = vector.broadcast %109 : f32 to vector<1x128xf32>
    %112 = arith.mulf %111, %110 : vector<1x128xf32>
    %113 = arith.addf %108, %112 : vector<1x128xf32>
    %c22 = arith.constant 22 : index
    %114 = memref.load %arg3[%c22] : memref<35xf32, #tpu.memory_space<smem>>
    %115 = vector.extract_strided_slice %84 {offsets = [0, 768], sizes = [1, 128], strides = [1, 1]} : vector<1x2048xf32> to vector<1x128xf32>
    %116 = vector.broadcast %114 : f32 to vector<1x128xf32>
    %117 = arith.mulf %116, %115 : vector<1x128xf32>
    %118 = arith.addf %113, %117 : vector<1x128xf32>
    %c23 = arith.constant 23 : index
    %119 = memref.load %arg3[%c23] : memref<35xf32, #tpu.memory_space<smem>>
    %120 = vector.extract_strided_slice %84 {offsets = [0, 896], sizes = [1, 128], strides = [1, 1]} : vector<1x2048xf32> to vector<1x128xf32>
    %121 = vector.broadcast %119 : f32 to vector<1x128xf32>
    %122 = arith.mulf %121, %120 : vector<1x128xf32>
    %123 = arith.addf %118, %122 : vector<1x128xf32>
    %c24 = arith.constant 24 : index
    %124 = memref.load %arg3[%c24] : memref<35xf32, #tpu.memory_space<smem>>
    %125 = vector.extract_strided_slice %84 {offsets = [0, 1024], sizes = [1, 128], strides = [1, 1]} : vector<1x2048xf32> to vector<1x128xf32>
    %126 = vector.broadcast %124 : f32 to vector<1x128xf32>
    %127 = arith.mulf %126, %125 : vector<1x128xf32>
    %128 = arith.addf %123, %127 : vector<1x128xf32>
    %c25 = arith.constant 25 : index
    %129 = memref.load %arg3[%c25] : memref<35xf32, #tpu.memory_space<smem>>
    %130 = vector.extract_strided_slice %84 {offsets = [0, 1152], sizes = [1, 128], strides = [1, 1]} : vector<1x2048xf32> to vector<1x128xf32>
    %131 = vector.broadcast %129 : f32 to vector<1x128xf32>
    %132 = arith.mulf %131, %130 : vector<1x128xf32>
    %133 = arith.addf %128, %132 : vector<1x128xf32>
    %c26 = arith.constant 26 : index
    %134 = memref.load %arg3[%c26] : memref<35xf32, #tpu.memory_space<smem>>
    %135 = vector.extract_strided_slice %84 {offsets = [0, 1280], sizes = [1, 128], strides = [1, 1]} : vector<1x2048xf32> to vector<1x128xf32>
    %136 = vector.broadcast %134 : f32 to vector<1x128xf32>
    %137 = arith.mulf %136, %135 : vector<1x128xf32>
    %138 = arith.addf %133, %137 : vector<1x128xf32>
    %c27 = arith.constant 27 : index
    %139 = memref.load %arg3[%c27] : memref<35xf32, #tpu.memory_space<smem>>
    %140 = vector.extract_strided_slice %84 {offsets = [0, 1408], sizes = [1, 128], strides = [1, 1]} : vector<1x2048xf32> to vector<1x128xf32>
    %141 = vector.broadcast %139 : f32 to vector<1x128xf32>
    %142 = arith.mulf %141, %140 : vector<1x128xf32>
    %143 = arith.addf %138, %142 : vector<1x128xf32>
    %c28 = arith.constant 28 : index
    %144 = memref.load %arg3[%c28] : memref<35xf32, #tpu.memory_space<smem>>
    %145 = vector.extract_strided_slice %84 {offsets = [0, 1536], sizes = [1, 128], strides = [1, 1]} : vector<1x2048xf32> to vector<1x128xf32>
    %146 = vector.broadcast %144 : f32 to vector<1x128xf32>
    %147 = arith.mulf %146, %145 : vector<1x128xf32>
    %148 = arith.addf %143, %147 : vector<1x128xf32>
    %c29 = arith.constant 29 : index
    %149 = memref.load %arg3[%c29] : memref<35xf32, #tpu.memory_space<smem>>
    %150 = vector.extract_strided_slice %84 {offsets = [0, 1664], sizes = [1, 128], strides = [1, 1]} : vector<1x2048xf32> to vector<1x128xf32>
    %151 = vector.broadcast %149 : f32 to vector<1x128xf32>
    %152 = arith.mulf %151, %150 : vector<1x128xf32>
    %153 = arith.addf %148, %152 : vector<1x128xf32>
    %c30 = arith.constant 30 : index
    %154 = memref.load %arg3[%c30] : memref<35xf32, #tpu.memory_space<smem>>
    %155 = vector.extract_strided_slice %84 {offsets = [0, 1792], sizes = [1, 128], strides = [1, 1]} : vector<1x2048xf32> to vector<1x128xf32>
    %156 = vector.broadcast %154 : f32 to vector<1x128xf32>
    %157 = arith.mulf %156, %155 : vector<1x128xf32>
    %158 = arith.addf %153, %157 : vector<1x128xf32>
    %c31 = arith.constant 31 : index
    %159 = memref.load %arg3[%c31] : memref<35xf32, #tpu.memory_space<smem>>
    %160 = vector.extract_strided_slice %84 {offsets = [0, 1920], sizes = [1, 128], strides = [1, 1]} : vector<1x2048xf32> to vector<1x128xf32>
    %161 = vector.broadcast %159 : f32 to vector<1x128xf32>
    %162 = arith.mulf %161, %160 : vector<1x128xf32>
    %163 = arith.addf %158, %162 : vector<1x128xf32>
    %c33 = arith.constant 33 : index
    %164 = memref.load %arg3[%c33] : memref<35xf32, #tpu.memory_space<smem>>
    %cst_14 = arith.constant 0.000000e+00 : f32
    %165 = arith.maximumf %164, %cst_14 : f32
    %c34 = arith.constant 34 : index
    %166 = memref.load %arg3[%c34] : memref<35xf32, #tpu.memory_space<smem>>
    %cst_15 = arith.constant 0.000000e+00 : f32
    %167 = arith.maximumf %166, %cst_15 : f32
    %168 = arith.mulf %163, %2 : vector<1x128xf32>
    %169 = vector.broadcast %165 : f32 to vector<1x128xf32>
    %170 = arith.mulf %169, %168 : vector<1x128xf32>
    %171 = vector.broadcast %167 : f32 to vector<1x128xf32>
    %172 = arith.addf %170, %171 : vector<1x128xf32>
    %c0_16 = arith.constant 0 : index
    %c0_17 = arith.constant 0 : index
    %173 = vector.load %arg4[%c0_16, %c0_17] : memref<1x128xf32, #tpu.memory_space<vmem>>, vector<1x128xf32>
    tpu.vector_store %arg4[%c0_16, %c0_17], %172 {strides = array<i32>} : memref<1x128xf32, #tpu.memory_space<vmem>>, vector<1x128xf32>,
    return
  }
  func.func @transform_0(%arg0: i32) -> (i32, i32) {
    %c0_i32 = arith.constant 0 : i32
    %c0_i32_0 = arith.constant 0 : i32
    return %c0_i32, %arg0 : i32, i32
  }
  func.func @transform_1(%arg0: i32) -> (i32, i32) {
    %c0_i32 = arith.constant 0 : i32
    %c0_i32_0 = arith.constant 0 : i32
    %c0_i32_1 = arith.constant 0 : i32
    return %c0_i32, %c0_i32_0 : i32, i32
  }
  func.func @transform_2(%arg0: i32) -> i32 {
    %c0_i32 = arith.constant 0 : i32
    %c0_i32_0 = arith.constant 0 : i32
    return %c0_i32 : i32
  }
  func.func @transform_3(%arg0: i32) -> (i32, i32) {
    %c0_i32 = arith.constant 0 : i32
    %c0_i32_0 = arith.constant 0 : i32
    return %c0_i32, %arg0 : i32, i32
  }
}

</mosaic_0001>

<bundles_post_ra>
// kernel: bernstein_forward_pallas.1
= control target key start
LH: loop header
LB: loop body
LE: loop exit
PB: predicated region body
PF: predicated region fallthrough
CT: control target
= control target key end

     0   :  { %8 = vsyncpa [#allocation3], 0  ;;  %s6010_s0 = inlined_call_operand.vmem [shape: f32[1,256], index: 0, kind: input, shape index: {}]   ;;  %s6011_s1 = inlined_call_operand.hbm [shape: f32[32,43], index: 1, kind: input, shape index: {}]   ;;  %s6012_s2 = inlined_call_operand.vmem [shape: f32[35], index: 2, kind: input, shape index: {}]   ;;  %s6013_s3 = inlined_call_operand.hbm [shape: f32[1,256], index: 3, kind: output, shape index: {}]  }
   0x1   :  { %9 = vsyncpa [#allocation5], 0 }
   0x2   :  { %10 = vsyncpa [#allocation4], 0 }
   0x3   :  { %12 = vsyncpa [#allocation4 + $0x1], 0  ;;  %s4226_s12 = smov 0   ;;  %s4228_s13 = smov 0  }
   0x4   :  { %s4230_s14 = smov 0   ;;  %s4232_s15 = smov 0  }
   0x5 LB: > { %s4247_s16 = sadd.s32 4294967295, %s4194_s15   ;;  %s3361_s17 = sadd.s32 4294967294, %s4194_s15   ;;  %s4194_s15 = sphi %s4232_s15, %s6093_s15   ;;  %s4190_s14 = sphi %s4230_s14, %s6092_s14   ;;  %s4186_s13 = sphi %s4228_s13, %s6091_s13   ;;  %s4182_s12 = sphi %s4226_s12, %s6090_s12  }
   0x6   : > { %s4251_s18 = sadd.s32 1, %s4194_s15   ;;  %s93_s19 = sadd.s32 1, %s4190_s14 }
   0x7   : > { %s90_s20 = ssub.s32 %s4194_s15, %s4251_s18  ;;  %p103_p0 = scmp.ne.s32.totalorder %s4190_s14, %s4186_s13 }
   0x8   : > { %p91_p1 = scmp.eq.s32.totalorder %s90_s20, 0  ;;  %p104_p2 = scmp.eq.s32.totalorder %s4247_s16, 1 }
   0x9   : > { %p109_p3 = scmp.ne.s32.totalorder %s4186_s13, %s4182_s12  ;;  %p110_p4 = scmp.eq.s32.totalorder %s3361_s17, 1 }
   0xa   : > { %s4262_s21 = scalar_select %p91_p1, %s4190_s14, %s93_s19  }
   0xb   : > { %p4264_p5 = por %p104_p2, %p103_p0  ;;  %p4268_p6 = por %p110_p4, %p109_p3 }
   0xc   : > { %p3362_p7 = scmp.ge.s32.totalorder %s4194_s15, 1  ;;  %p117_p8 = scmp.lt.s32.totalorder %s4194_s15, 3 }
   0xd   : > { %s6033_s22 = scalar_select %p4264_p5, 1, 0 }
   0xe   : > { %s6034_s23 = scalar_select %p4268_p6, 1, 0 }
   0xf   : > { %p6014_p9 = scmp.eq.s32.totalorder %s4247_s16, 0  ;;  %p4275_p10 = pnand %p3362_p7, %p117_p8 }
  0x10   : > { %s4196_s25 = smov [#allocation2]   ;;  %s143_s29 = sshll.u32 %s6012_s2, 4  ;;  %s4290_s29 = int_to_ptr.vmem [resolvable:$true] %s143_s29 }
  0x11   : > { %s6035_s24 = scalar_select %p4275_p10, 1, 0 }
  0x12   : > { %s129_s26 = sshll.u32 %s4196_s25, 4  ;;  %p3760_p11 = pneg %p4275_p10  ;;  %s130_s26 = int_to_ptr.vmem [resolvable:$true] %s129_s26 }
  0x13   : > { %s4081_s6 = scalar_lea.hbm %s6011_s1, 512 }
  0x14   : > { %p4286_p12 = pnand %p6014_p9, %p3760_p11  ;;  %p4082_p13 = scmp.ne.s32.totalorder %s6011_s1, %s4081_s6 }
  0x15   : > { %p4088_p3 = scmp.lt.u32.totalorder %s4081_s6, %s6011_s1 }
  0x16   : > { %p4083_p0 = pneg %p4286_p12 }
  0x18   : > { %p4084_p1 = pnand %p4083_p0, %p4082_p13 }
  0x1a   : > { %p4085_p2 = pneg %p4084_p1 }
  0x1c   : > { %p4090_p4 = pnand %p4088_p3, %p4085_p2 }
  0x1e   : > { %4093 = shalt.err (!%p4090_p4)
}
  0x1f   : > { %s4094_s11 = scalar_lea.vmem %s130_s26, 512  ;;  %p4102_p9 = scmp.lt.s32.totalorder %s130_s26, %s130_s26 }
  0x20   : > { %p4095_p7 = scmp.ne.s32.totalorder %s130_s26, %s4094_s11  ;;  %p4103_p6 = scmp.lt.s32.totalorder %s4094_s11, %s4094_s11 }
  0x22   : > { %p4097_p8 = pnand %p4095_p7, %p4083_p0  ;;  %p4104_p5 = por %p4103_p6, %p4102_p9 }
  0x24   : > { %p4098_p11 = pneg %p4097_p8 }
  0x26   : > { %p4105_p10 = pnand %p4104_p5, %p4098_p11 }
  0x28   : > { %4108 = shalt.err (!%p4105_p10)
}
  0x29   : > { %s4197_s17 = smov 128   ;;  %s4198_s19 = smov 8  }
  0x2a   : > { %3763 = dma.hbm_to_vmem [thread:$0]  (!%p4286_p12), %s6011_s1, 512, %s130_s26, [#allocation3], %s4197_s17, %s4197_s17, %s4198_s19  }
  0x2b   : > { %s4109_s27 = scalar_lea.vmem %s4290_s29, 16  ;;  %p4117_p5 = scmp.lt.s32.totalorder %s4290_s29, %s4290_s29 }
  0x2c   : > { %p4110_p13 = scmp.ne.s32.totalorder %s4290_s29, %s4109_s27  ;;  %p4118_p9 = scmp.lt.s32.totalorder %s4109_s27, %s4109_s27 }
  0x2e   : > { %p4112_p1 = pnand %p4110_p13, %p4083_p0  ;;  %p4119_p10 = por %p4118_p9, %p4117_p5 }
  0x30   : > { %p4113_p6 = pneg %p4112_p1 }
  0x32   : > { %p4120_p2 = pnand %p4119_p10, %p4113_p6 }
  0x34   : > { %4123 = shalt.err (!%p4120_p2)
}
  0x35   : > { %s4199_s28 = smov [#allocation6]   ;;  %p6037_p3 = scmp.ne.s32.totalorder %s6035_s24, 0 }
  0x36   : > { %3766 = dma.vmem_to_smem (!%p4286_p12), %s4290_s29, 16, %s4199_s28, [#allocation5]  }
  0x37   : > { %162 = sbr.rel (%p6037_p3) target bundleno = 1051 (0x41b), region = 32 }
  0x3e   : > { %p6038_p4 = scmp.eq.s32.totalorder %s4247_s16, 0 }
  0x40   : > { %4169 = dma.done.wait (%p6038_p4), [#allocation3], 512   ;;  %p6039_p0 = pmov %p6038_p4 }
  0x42   : > { %4171 = vsyncadd (%p6039_p0), [#allocation3], 4294966784  ;;  %p6040_p7 = pmov %p6039_p0 }
  0x43   : > { %p6041_p8 = pmov %p6039_p0 }
  0x44   : > { %4173 = dma.done.wait (%p6040_p7), [#allocation5], 16  }
  0x45   : > { %4175 = vsyncadd (%p6041_p8), [#allocation5], 4294967280 }
  0x46   : > { %172 = sfence }
  0x47   : > { %v4334_v0 = vld [vmem:[#allocation2] sm:$0xff]  ;;  %v4336_v1 = vld [vmem:[#allocation2 + $0x10] sm:$0xff]  ;;  %p188_p12 = scmp.lt.s32.totalorder %s4247_s16, 1  ;;  %s4200_s24 = smov 95   ;;  %v4341_v2 = vld [vmem:[#allocation2 + $0x8] sm:$0xff]  ;;  %v6017_v4 = vmov 0.0  }
  0x48   : > { %267 = vrot.lane.b32.xlu0 %v4334_v0, %s4200_s24  ;;  %271 = vrot.lane.b32.xlu1 %v4336_v1, %s4200_s24  ;;  %v4343_v3 = vld [vmem:[#allocation2 + $0x18] sm:$0xff]  ;;  %s3369_s5 = sld [smem:[#allocation6 + $0x1]]  ;;  %s3371_s6 = sld [smem:[#allocation6 + $0x3]]  ;;  %vm246_vm0 = vcmask 1040384   ;;  %vm284_vm1 = vcmask 1041408   ;;  %vm275_vm2 = vcmask 15360  }
  0x49   : > { %s189_s26 = scalar_select %p188_p12, %s4247_s16, 1  ;;  %397 = vmatprep.mubr.f32.mxu0 %v6017_v4  ;;  %486 = vmatprep.mubr.f32.mxu1 %v6017_v4  ;;  %v4203_v59 = vmov 32  }
  0x4a   : > { %s198_s7 = sld [smem:[#allocation6]]  ;;  %s3370_s8 = sld [smem:[#allocation6 + $0x2]]  ;;  %3818 = vset.pattern.permute.xlu1 %v4203_v59  ;;  %3817 = vset.pattern.permute.xlu0 %v4203_v59 }
  0x4b   : > { %s190_s4 = scalar_lea.vmem %s6010_s0, %s189_s26  ;;  %s3373_s9 = sld [smem:[#allocation6 + $0x5]] }
  0x4c   : > { %269 = vrot.lane.b32.xlu0 %v4341_v2, %s4200_s24  ;;  %273 = vrot.lane.b32.xlu1 %v4343_v3, %s4200_s24  ;;  %v191_v5 = vld [vmem:[%s190_s4] sm:$0x1]  ;;  %s3375_s10 = sld [smem:[#allocation6 + $0x7]]  ;;  %s3372_s11 = sld [smem:[#allocation6 + $0x4]] }
  0x4d   : > { %3819 = vrcp.f32 %v191_v5  ;;  %s3374_s17 = sld [smem:[#allocation6 + $0x6]]  ;;  %s3377_s19 = sld [smem:[#allocation6 + $0x9]] }
  0x4e   : > { %v202_v6 = vstv %s3369_s5  ;;  %v208_v7 = vstv %s3371_s6  ;;  %s3379_s20 = sld [smem:[#allocation6 + $0xb]]  ;;  %s3376_s25 = sld [smem:[#allocation6 + $0x8]] }
  0x4f   : > { %s3378_s27 = sld [smem:[#allocation6 + $0xa]]  ;;  %s3381_s28 = sld [smem:[#allocation6 + $0xd]] }
  0x50   : > { %v199_v8 = vstv %s198_s7  ;;  %v205_v9 = vstv %s3370_s8  ;;  %s3383_s24 = sld [smem:[#allocation6 + $0xf]]  ;;  %s3380_s26 = sld [smem:[#allocation6 + $0xc]] }
  0x51   : > { %v214_v10 = vstv %s3373_s9  ;;  %s3382_s29 = sld [smem:[#allocation6 + $0xe]]  ;;  %s4202_s30 = smov 93  }
  0x52   : > { %v220_v11 = vstv %s3375_s10  ;;  %v211_v25 = vstv %s3372_s11  ;;  %2552 = vrot.lane.b32.xlu1 %v4341_v2, %s4202_s30  ;;  %2550 = vrot.lane.b32.xlu0 %v4334_v0, %s4202_s30  ;;  %s3600_s4 = sld [smem:[#allocation6 + $0x20]]  ;;  %s3602_s6 = sld [smem:[#allocation6 + $0x11]] }
  0x53   : > { %v217_v26 = vstv %s3374_s17  ;;  %v226_v27 = vstv %s3377_s19  ;;  %s3601_s5 = sld [smem:[#allocation6 + $0x10]]  ;;  %s3603_s7 = sld [smem:[#allocation6 + $0x12]] }
  0x54   : > { %v232_v28 = vstv %s3379_s20  ;;  %v223_v40 = vstv %s3376_s25  ;;  %s3604_s8 = sld [smem:[#allocation6 + $0x13]]  ;;  %s3605_s9 = sld [smem:[#allocation6 + $0x14]] }
  0x55   : > { %v229_v41 = vstv %s3378_s27  ;;  %v238_v43 = vstv %s3381_s28  ;;  %s3606_s10 = sld [smem:[#allocation6 + $0x15]]  ;;  %s3607_s11 = sld [smem:[#allocation6 + $0x16]] }
  0x56   : > { %v244_v44 = vstv %s3383_s24  ;;  %v235_v53 = vstv %s3380_s26  ;;  %1434 = vperm.xlu1 %3818, %v4341_v2   ;;  %1430 = vperm.xlu0 %3817, %v4334_v0   ;;  %s3608_s17 = sld [smem:[#allocation6 + $0x17]]  ;;  %s3609_s19 = sld [smem:[#allocation6 + $0x18]] }
  0x57   : > { %v4353_v12 = vpop.eup %3819  ;;  %v241_v54 = vstv %s3382_s29  ;;  %s3610_s20 = sld [smem:[#allocation6 + $0x19]]  ;;  %s3611_s25 = sld [smem:[#allocation6 + $0x1a]] }
  0x58   : > { %6042 = vst [vmem:[#allocation11_spill] sm:$0xff] %v4353_v12  ;;  %v203_v13 = vmul.f32 %v4353_v12, %v202_v6  ;;  %v209_v14 = vmul.f32 %v4353_v12, %v208_v7  ;;  %v200_v15 = vmul.f32 %v4353_v12, %v199_v8  ;;  %v206_v16 = vmul.f32 %v4353_v12, %v205_v9  ;;  %s3612_s27 = sld [smem:[#allocation6 + $0x1b]]  ;;  %s3613_s28 = sld [smem:[#allocation6 + $0x1c]] }
  0x59   : > { %v215_v17 = vmul.f32 %v4353_v12, %v214_v10  ;;  %v221_v18 = vmul.f32 %v4353_v12, %v220_v11  ;;  %v212_v29 = vmul.f32 %v4353_v12, %v211_v25  ;;  %v218_v30 = vmul.f32 %v4353_v12, %v217_v26  ;;  %s3614_s24 = sld [smem:[#allocation6 + $0x1d]]  ;;  %s3615_s26 = sld [smem:[#allocation6 + $0x1e]] }
  0x5a   : > { %v248_v19 = vsel %vm246_vm0, %v203_v13, 1.0  ;;  %v250_v20 = vsel %vm246_vm0, %v209_v14, 1.0  ;;  %v247_v21 = vsel %vm246_vm0, %v200_v15, 1.0  ;;  %v249_v22 = vsel %vm246_vm0, %v206_v16, 1.0  ;;  %2554 = vrot.lane.b32.xlu1 %v4336_v1, %s4202_s30  ;;  %2556 = vrot.lane.b32.xlu0 %v4343_v3, %s4202_s30  ;;  %s3616_s29 = sld [smem:[#allocation6 + $0x1f]]  ;;  %s3617_s30 = sld [smem:[#allocation6 + $0x21]] }
  0x5b   : > { %3384 = vmatprep.subr.msk.mxu0 %vm284_vm1, %v248_v19  ;;  %3390 = vmatprep.subr.msk.mxu1 %vm284_vm1, %v250_v20  ;;  %v252_v23 = vsel %vm246_vm0, %v215_v17, 1.0  ;;  %v254_v24 = vsel %vm246_vm0, %v221_v18, 1.0  ;;  %v227_v31 = vmul.f32 %v4353_v12, %v226_v27  ;;  %v233_v32 = vmul.f32 %v4353_v12, %v232_v28  ;;  %p6088_p13 = scmp.ne.s32.totalorder %s6033_s22, 0 }
  0x5c   : > { %3385 = vmatpush1.msk.msra.mxu0 %vm284_vm1, %v247_v21  ;;  %3391 = vmatpush1.msk.msra.mxu1 %vm284_vm1, %v249_v22  ;;  %v251_v34 = vsel %vm246_vm0, %v212_v29, 1.0  ;;  %v253_v35 = vsel %vm246_vm0, %v218_v30, 1.0  ;;  %v224_v45 = vmul.f32 %v4353_v12, %v223_v40  ;;  %v230_v46 = vmul.f32 %v4353_v12, %v229_v41 }
  0x5d   : > { %3396 = vmatprep.subr.msk.mxu0 %vm284_vm1, %v252_v23  ;;  %3402 = vmatprep.subr.msk.mxu1 %vm284_vm1, %v254_v24  ;;  %v256_v36 = vsel %vm246_vm0, %v227_v31, 1.0  ;;  %v258_v37 = vsel %vm246_vm0, %v233_v32, 1.0  ;;  %v239_v47 = vmul.f32 %v4353_v12, %v238_v43  ;;  %v245_v48 = vmul.f32 %v4353_v12, %v244_v44 }
  0x5e   : > { %v255_v49 = vsel %vm246_vm0, %v224_v45, 1.0  ;;  %v257_v50 = vsel %vm246_vm0, %v230_v46, 1.0  ;;  %v236_v55 = vmul.f32 %v4353_v12, %v235_v53  ;;  %v242_v56 = vmul.f32 %v4353_v12, %v241_v54  ;;  %1438 = vperm.xlu1 %3818, %v4336_v1   ;;  %1442 = vperm.xlu0 %3817, %v4343_v3  }
  0x5f   : > { %v260_v51 = vsel %vm246_vm0, %v239_v47, 1.0  ;;  %v262_v52 = vsel %vm246_vm0, %v245_v48, 1.0 }
  0x60   : > { %v259_v57 = vsel %vm246_vm0, %v236_v55, 1.0  ;;  %v261_v58 = vsel %vm246_vm0, %v242_v56, 1.0 }
  0xba   : > { %v4377_v33 = vpop.permute.xlu0 %267  ;;  %v4393_v39 = vpop.permute.xlu1 %271 }
  0xbb   : > { %3386 = vmatmul.mubr.msk.f32.vlgmr.msra.gmra.mrb[0].mxu0 %vm275_vm2, %v4377_v33  ;;  %3392 = vmatmul.mubr.msk.f32.vlgmr.msra.gmra.mrb[0].mxu1 %vm275_vm2, %v4377_v33 }
  0xbc   : > { %403 = vmatprep.mubr.f32.mxu0 %v6017_v4  ;;  %492 = vmatprep.mubr.f32.mxu1 %v6017_v4 }
  0xbd   : > { %3397 = vmatpush1.msk.msra.mxu0 %vm284_vm1, %v251_v34  ;;  %3403 = vmatpush1.msk.msra.mxu1 %vm284_vm1, %v253_v35 }
  0xbe   : > { %v4391_v38 = vpop.permute.xlu0 %269  ;;  %3408 = vmatprep.subr.msk.mxu0 %vm284_vm1, %v256_v36  ;;  %3414 = vmatprep.subr.msk.mxu1 %vm284_vm1, %v258_v37  ;;  %v4407_v42 = vpop.permute.xlu1 %273 }
  0xbf   : > { %3387 = vmatmul.mubr.msk.f32.gmra.mrb[2].mxu0 %vm275_vm2, %v4391_v38  ;;  %3393 = vmatmul.mubr.msk.f32.gmra.mrb[2].mxu1 %vm275_vm2, %v4391_v38 }
  0xc0   : > { %409 = vmatprep.mubr.f32.mxu0 %v6017_v4  ;;  %498 = vmatprep.mubr.f32.mxu1 %v6017_v4 }
  0xc3   : > { %3388 = vmatmul.mubr.msk.f32.gmra.mrb[4].mxu0 %vm275_vm2, %v4393_v39  ;;  %3394 = vmatmul.mubr.msk.f32.gmra.mrb[4].mxu1 %vm275_vm2, %v4393_v39 }
  0xc4   : > { %415 = vmatprep.mubr.f32.mxu0 %v6017_v4  ;;  %504 = vmatprep.mubr.f32.mxu1 %v6017_v4 }
  0xc7   : > { %3389 = vmatmul.mubr.msk.f32.gmra.mrb[6].mxu0 %vm275_vm2, %v4407_v42  ;;  %3395 = vmatmul.mubr.msk.f32.gmra.mrb[6].mxu1 %vm275_vm2, %v4407_v42 }
  0xc8   : > { %575 = vmatprep.mubr.f32.mxu0 %v6017_v4  ;;  %664 = vmatprep.mubr.f32.mxu1 %v6017_v4 }
  0xcb   : > { %3398 = vmatmul.mubr.msk.f32.vlgmr.msra.gmra.mrb[8].mxu0 %vm275_vm2, %v4377_v33  ;;  %3404 = vmatmul.mubr.msk.f32.vlgmr.msra.gmra.mrb[8].mxu1 %vm275_vm2, %v4377_v33 }
  0xcc   : > { %581 = vmatprep.mubr.f32.mxu0 %v6017_v4  ;;  %670 = vmatprep.mubr.f32.mxu1 %v6017_v4 }
  0xcd   : > { %3409 = vmatpush1.msk.msra.mxu0 %vm284_vm1, %v255_v49  ;;  %3415 = vmatpush1.msk.msra.mxu1 %vm284_vm1, %v257_v50 }
  0xce   : > { %3420 = vmatprep.subr.msk.mxu0 %vm284_vm1, %v260_v51  ;;  %3426 = vmatprep.subr.msk.mxu1 %vm284_vm1, %v262_v52 }
  0xcf   : > { %3399 = vmatmul.mubr.msk.f32.gmra.mrb[10].mxu0 %vm275_vm2, %v4391_v38  ;;  %3405 = vmatmul.mubr.msk.f32.gmra.mrb[10].mxu1 %vm275_vm2, %v4391_v38 }
  0xd0   : > { %587 = vmatprep.mubr.f32.mxu0 %v6017_v4  ;;  %676 = vmatprep.mubr.f32.mxu1 %v6017_v4 }
  0xd3   : > { %3400 = vmatmul.mubr.msk.f32.gmra.mrb[12].mxu0 %vm275_vm2, %v4393_v39  ;;  %3406 = vmatmul.mubr.msk.f32.gmra.mrb[12].mxu1 %vm275_vm2, %v4393_v39 }
  0xd4   : > { %593 = vmatprep.mubr.f32.mxu0 %v6017_v4  ;;  %682 = vmatprep.mubr.f32.mxu1 %v6017_v4 }
  0xd7   : > { %3401 = vmatmul.mubr.msk.f32.gmra.mrb[14].mxu0 %vm275_vm2, %v4407_v42  ;;  %3407 = vmatmul.mubr.msk.f32.gmra.mrb[14].mxu1 %vm275_vm2, %v4407_v42 }
  0xd8   : > { %753 = vmatprep.mubr.f32.mxu0 %v6017_v4  ;;  %842 = vmatprep.mubr.f32.mxu1 %v6017_v4 }
  0xdb   : > { %3410 = vmatmul.mubr.msk.f32.vlgmr.msra.gmra.mrb[16].mxu0 %vm275_vm2, %v4377_v33  ;;  %3416 = vmatmul.mubr.msk.f32.vlgmr.msra.gmra.mrb[16].mxu1 %vm275_vm2, %v4377_v33 }
  0xdc   : > { %759 = vmatprep.mubr.f32.mxu0 %v6017_v4  ;;  %848 = vmatprep.mubr.f32.mxu1 %v6017_v4 }
  0xdd   : > { %3421 = vmatpush1.msk.msra.mxu0 %vm284_vm1, %v259_v57  ;;  %3427 = vmatpush1.msk.msra.mxu1 %vm284_vm1, %v261_v58 }
  0xdf   : > { %3411 = vmatmul.mubr.msk.f32.gmra.mrb[18].mxu0 %vm275_vm2, %v4391_v38  ;;  %3417 = vmatmul.mubr.msk.f32.gmra.mrb[18].mxu1 %vm275_vm2, %v4391_v38 }
  0xe0   : > { %765 = vmatprep.mubr.f32.mxu0 %v6017_v4  ;;  %854 = vmatprep.mubr.f32.mxu1 %v6017_v4 }
  0xe3   : > { %3412 = vmatmul.mubr.msk.f32.gmra.mrb[20].mxu0 %vm275_vm2, %v4393_v39  ;;  %3418 = vmatmul.mubr.msk.f32.gmra.mrb[20].mxu1 %vm275_vm2, %v4393_v39 }
  0xe4   : > { %771 = vmatprep.mubr.f32.mxu0 %v6017_v4  ;;  %860 = vmatprep.mubr.f32.mxu1 %v6017_v4 }
  0xe7   : > { %3413 = vmatmul.mubr.msk.f32.gmra.mrb[22].mxu0 %vm275_vm2, %v4407_v42  ;;  %3419 = vmatmul.mubr.msk.f32.gmra.mrb[22].mxu1 %vm275_vm2, %v4407_v42 }
  0xe8   : > { %931 = vmatprep.mubr.f32.mxu0 %v6017_v4  ;;  %1020 = vmatprep.mubr.f32.mxu1 %v6017_v4 }
  0xeb   : > { %3422 = vmatmul.mubr.msk.f32.vlgmr.msra.gmra.mrb[24].mxu0 %vm275_vm2, %v4377_v33  ;;  %3428 = vmatmul.mubr.msk.f32.vlgmr.msra.gmra.mrb[24].mxu1 %vm275_vm2, %v4377_v33 }
  0xec   : > { %937 = vmatprep.mubr.f32.mxu0 %v6017_v4  ;;  %1026 = vmatprep.mubr.f32.mxu1 %v6017_v4 }
  0xef   : > { %3423 = vmatmul.mubr.msk.f32.gmra.mrb[26].mxu0 %vm275_vm2, %v4391_v38  ;;  %3429 = vmatmul.mubr.msk.f32.gmra.mrb[26].mxu1 %vm275_vm2, %v4391_v38 }
  0xf0   : > { %943 = vmatprep.mubr.f32.mxu0 %v6017_v4  ;;  %1032 = vmatprep.mubr.f32.mxu1 %v6017_v4 }
  0xf3   : > { %3424 = vmatmul.mubr.msk.f32.gmra.mrb[28].mxu0 %vm275_vm2, %v4393_v39  ;;  %3430 = vmatmul.mubr.msk.f32.gmra.mrb[28].mxu1 %vm275_vm2, %v4393_v39 }
  0xf4   : > { %949 = vmatprep.mubr.f32.mxu0 %v6017_v4  ;;  %1038 = vmatprep.mubr.f32.mxu1 %v6017_v4 }
  0xf7   : > { %3425 = vmatmul.mubr.msk.f32.gmra.mrb[30].mxu0 %vm275_vm2, %v4407_v42  ;;  %3431 = vmatmul.mubr.msk.f32.gmra.mrb[30].mxu1 %vm275_vm2, %v4407_v42 }
  0xf8   : > { %1518 = vmatprep.mubr.f32.mxu0 %v6017_v4  ;;  %1607 = vmatprep.mubr.f32.mxu1 %v6017_v4 }
 0x18e   : > { %v4515_v60 = vpop.f32.mrb[0].mxu0  ;;  %v4517_v61 = vpop.f32.mrb[0].mxu1 }
 0x18f   : > { %v1109_v62 = vmin.f32 %v4515_v60, 0.0  ;;  %v1111_v63 = vmin.f32 %v4517_v61, 0.0  ;;  %v4521_v5 = vpop.f32.mrb[1].mxu0  ;;  %v4523_v6 = vpop.f32.mrb[1].mxu1  ;;  %vm1045_vm3 = vcmp.gt.f32.partialorder %v4515_v60, 0.0  ;;  %vm1047_vm4 = vcmp.gt.f32.partialorder %v4517_v61, 0.0 }
 0x190   : > { %v1110_v23 = vmin.f32 %v4521_v5, 0.0  ;;  %v1112_v30 = vmin.f32 %v4523_v6, 0.0  ;;  %vm1046_vm11 = vcmp.gt.f32.partialorder %v4521_v5, 0.0  ;;  %vm1048_vm14 = vcmp.gt.f32.partialorder %v4523_v6, 0.0 }
 0x191   : > { %v1173_v7 = vmul.f32 1.442695, %v1109_v62  ;;  %v1177_v8 = vmul.f32 1.442695, %v1111_v63 }
 0x192   : > { %v4525_v9 = vpop.f32.mrb[2].mxu0  ;;  %v4527_v10 = vpop.f32.mrb[2].mxu1  ;;  %v1175_v39 = vmul.f32 1.442695, %v1110_v23  ;;  %v1179_v43 = vmul.f32 1.442695, %v1112_v30 }
 0x193   : > { %3821 = vpow2.f32 %v1173_v7  ;;  %v1125_v1 = vmin.f32 %v4525_v9, 0.0  ;;  %v4530_v3 = vpop.f32.mrb[3].mxu0  ;;  %v4532_v11 = vpop.f32.mrb[3].mxu1  ;;  %v1127_v13 = vmin.f32 %v4527_v10, 0.0  ;;  %vm1061_vm5 = vcmp.gt.f32.partialorder %v4525_v9, 0.0 }
 0x194   : > { %3823 = vpow2.f32 %v1177_v8  ;;  %v1126_v16 = vmin.f32 %v4530_v3, 0.0  ;;  %v1128_v24 = vmin.f32 %v4532_v11, 0.0  ;;  %vm1063_vm6 = vcmp.gt.f32.partialorder %v4527_v10, 0.0 }
 0x195   : > { %v1205_v14 = vmul.f32 1.442695, %v1125_v1  ;;  %v1209_v15 = vmul.f32 1.442695, %v1127_v13  ;;  %vm1062_vm12 = vcmp.gt.f32.partialorder %v4530_v3, 0.0  ;;  %vm1064_vm13 = vcmp.gt.f32.partialorder %v4532_v11, 0.0 }
 0x196   : > { %v4536_v17 = vpop.f32.mrb[4].mxu0  ;;  %v4538_v18 = vpop.f32.mrb[4].mxu1  ;;  %v1207_v26 = vmul.f32 1.442695, %v1126_v16  ;;  %v1211_v36 = vmul.f32 1.442695, %v1128_v24 }
 0x197   : > { %3825 = vpow2.f32 %v1205_v14  ;;  %v1141_v19 = vmin.f32 %v4536_v17, 0.0  ;;  %v4541_v20 = vpop.f32.mrb[5].mxu0  ;;  %v4543_v21 = vpop.f32.mrb[5].mxu1  ;;  %v1143_v22 = vmin.f32 %v4538_v18, 0.0  ;;  %vm1077_vm7 = vcmp.gt.f32.partialorder %v4536_v17, 0.0 }
 0x198   : > { %3827 = vpow2.f32 %v1209_v15  ;;  %v1142_v44 = vmin.f32 %v4541_v20, 0.0  ;;  %v1144_v48 = vmin.f32 %v4543_v21, 0.0  ;;  %vm1079_vm8 = vcmp.gt.f32.partialorder %v4538_v18, 0.0 }
 0x199   : > { %v1237_v25 = vmul.f32 1.442695, %v1141_v19  ;;  %v1241_v27 = vmul.f32 1.442695, %v1143_v22  ;;  %vm1078_vm1 = vcmp.gt.f32.partialorder %v4541_v20, 0.0 }
 0x19a   : > { %v4548_v28 = vpop.f32.mrb[6].mxu0  ;;  %v4550_v29 = vpop.f32.mrb[6].mxu1  ;;  %v1239_v58 = vmul.f32 1.442695, %v1142_v44  ;;  %v1243_v1 = vmul.f32 1.442695, %v1144_v48 }
 0x19b   : > { %3829 = vpow2.f32 %v1237_v25  ;;  %v1157_v31 = vmin.f32 %v4548_v28, 0.0  ;;  %v4554_v32 = vpop.f32.mrb[7].mxu0  ;;  %v4556_v33 = vpop.f32.mrb[7].mxu1  ;;  %v1159_v34 = vmin.f32 %v4550_v29, 0.0  ;;  %vm1093_vm9 = vcmp.gt.f32.partialorder %v4548_v28, 0.0 }
 0x19c   : > { %3831 = vpow2.f32 %v1241_v27  ;;  %v1158_v53 = vmin.f32 %v4554_v32, 0.0  ;;  %vm1095_vm10 = vcmp.gt.f32.partialorder %v4550_v29, 0.0  ;;  %vm1094_vm2 = vcmp.gt.f32.partialorder %v4554_v32, 0.0 }
 0x19d   : > { %v3822_v35 = vpop.eup %3821  ;;  %v1269_v37 = vmul.f32 1.442695, %v1157_v31  ;;  %3833 = vpow2.f32 %v1207_v26  ;;  %v1273_v40 = vmul.f32 1.442695, %v1159_v34 }
 0x19e   : > { %v3824_v38 = vpop.eup %3823  ;;  %v4559_v41 = vpop.f32.mrb[8].mxu0  ;;  %v3432_v47 = vadd.f32 -1.0, %v3822_v35  ;;  %v1271_v22 = vmul.f32 1.442695, %v1158_v53 }
 0x19f   : > { %v4561_v42 = vpop.f32.mrb[8].mxu1  ;;  %3835 = vpow2.f32 %v1269_v37  ;;  %v4564_v45 = vpop.f32.mrb[9].mxu0  ;;  %v3434_v50 = vadd.f32 -1.0, %v3824_v38  ;;  %v1113_v54 = vmin.f32 %v4559_v41, 0.0  ;;  %vm1049_vm15 = vcmp.gt.f32.partialorder %v4559_v41, 0.0 }
 0x1a0   : > { %v4566_v46 = vpop.f32.mrb[9].mxu1  ;;  %3837 = vpow2.f32 %v1273_v40  ;;  %v1115_v59 = vmin.f32 %v4561_v42, 0.0  ;;  %v4586_v7 = vsel %vm1045_vm3, %v4515_v60, %v3432_v47  ;;  %v1114_v47 = vmin.f32 %v4564_v45, 0.0 }
 0x1a1   : > { %v3826_v49 = vpop.eup %3825  ;;  %3839 = vpow2.f32 %v1211_v36  ;;  %v4597_v14 = vsel %vm1047_vm4, %v4517_v61, %v3434_v50  ;;  %v1181_v16 = vmul.f32 1.442695, %v1113_v54  ;;  %v1160_v61 = vmin.f32 %v4556_v33, 0.0 }
 0x1a2   : > { %v3828_v51 = vpop.eup %3827  ;;  %3841 = vpow2.f32 %v1175_v39  ;;  %v3448_v52 = vadd.f32 -1.0, %v3826_v49  ;;  %v4574_v55 = vpop.f32.mrb[10].mxu0  ;;  %v1185_v25 = vmul.f32 1.442695, %v1115_v59  ;;  %v1116_v53 = vmin.f32 %v4566_v46, 0.0 }
 0x1a3   : > { %v4576_v56 = vpop.f32.mrb[10].mxu1  ;;  %3843 = vpow2.f32 %v1179_v43  ;;  %v3450_v57 = vadd.f32 -1.0, %v3828_v51  ;;  %v4579_v62 = vpop.f32.mrb[11].mxu0  ;;  %v1129_v37 = vmin.f32 %v4574_v55, 0.0  ;;  %v1275_v44 = vmul.f32 1.442695, %v1160_v61 }
 0x1a4   : > { %v4581_v63 = vpop.f32.mrb[11].mxu1  ;;  %v4591_v8 = vsel %vm1061_vm5, %v4525_v9, %v3448_v52  ;;  %3845 = vpow2.f32 %v1239_v58  ;;  %vm1051_vm0 = vcmp.gt.f32.partialorder %v4561_v42, 0.0  ;;  %vm1080_vm3 = vcmp.gt.f32.partialorder %v4543_v21, 0.0 }
 0x1a5   : > { %v3830_v13 = vpop.eup %3829  ;;  %v3624_v15 = vpack.c.bf16 %v4591_v8, %v4586_v7  ;;  %v4602_v60 = vsel %vm1063_vm6, %v4527_v10, %v3450_v57  ;;  %3847 = vpow2.f32 %v1243_v1  ;;  %v1213_v54 = vmul.f32 1.442695, %v1129_v37 }
 0x1a6   : > { %v3832_v19 = vpop.eup %3831  ;;  %v4606_v23 = vpop.f32.mrb[12].mxu0  ;;  %v3464_v30 = vadd.f32 -1.0, %v3830_v13  ;;  %3849 = vpow2.f32 %v1181_v16  ;;  %v1132_v37 = vmin.f32 %v4581_v63, 0.0  ;;  %vm1096_vm4 = vcmp.gt.f32.partialorder %v4556_v33, 0.0 }
 0x1a7   : > { %v4608_v24 = vpop.f32.mrb[12].mxu1  ;;  %v4611_v26 = vpop.f32.mrb[13].mxu0  ;;  %v3466_v34 = vadd.f32 -1.0, %v3832_v19  ;;  %3851 = vpow2.f32 %v1271_v22  ;;  %v1183_v22 = vmul.f32 1.442695, %v1114_v47  ;;  %vm1065_vm5 = vcmp.gt.f32.partialorder %v4574_v55, 0.0 }
 0x1a8   : > { %v4613_v27 = vpop.f32.mrb[13].mxu1  ;;  %v3834_v10 = vpop.eup %3833  ;;  %3853 = vpow2.f32 %v1185_v25  ;;  %v4633_v51 = vsel %vm1077_vm7, %v4536_v17, %v3464_v30  ;;  %v1130_v25 = vmin.f32 %v4579_v62, 0.0  ;;  %vm1067_vm6 = vcmp.gt.f32.partialorder %v4576_v56, 0.0 }
 0x1a9   : > { %v3836_v31 = vpop.eup %3835  ;;  %v4644_v58 = vsel %vm1079_vm8, %v4538_v18, %v3466_v34  ;;  %v3449_v1 = vadd.f32 -1.0, %v3834_v10  ;;  %3855 = vpow2.f32 %v1213_v54  ;;  %v1187_v34 = vmul.f32 1.442695, %v1116_v53 }
 0x1aa   : > { %v3838_v35 = vpop.eup %3837  ;;  %v3480_v36 = vadd.f32 -1.0, %v3836_v31  ;;  %v4620_v38 = vpop.f32.mrb[14].mxu0  ;;  %3857 = vpow2.f32 %v1275_v44  ;;  %v1145_v10 = vmin.f32 %v4606_v23, 0.0  ;;  %vm1445_vm7 = vcmask 261120  }
 0x1ab   : > { %v4622_v39 = vpop.f32.mrb[14].mxu1  ;;  %v3840_v40 = vpop.eup %3839  ;;  %v3482_v43 = vadd.f32 -1.0, %v3838_v35  ;;  %vm1050_vm8 = vcmp.gt.f32.partialorder %v4564_v45, 0.0 }
 0x1ac   : > { %v4626_v48 = vpop.f32.mrb[15].mxu0  ;;  %v4628_v49 = vpop.f32.mrb[15].mxu1  ;;  %v4638_v52 = vsel %vm1093_vm9, %v4548_v28, %v3480_v36  ;;  %v1131_v28 = vmin.f32 %v4576_v56, 0.0  ;;  %v3451_v13 = vadd.f32 -1.0, %v3840_v40  ;;  %v1245_v47 = vmul.f32 1.442695, %v1145_v10 }
 0x1ad   : > { %v3842_v50 = vpop.eup %3841  ;;  %v4651_v17 = vsel %vm1095_vm10, %v4550_v29, %v3482_v43  ;;  %v1382_v43 = vsel %vm1062_vm12, %v4530_v3, %v3449_v1  ;;  %vm1052_vm9 = vcmp.gt.f32.partialorder %v4566_v46, 0.0  ;;  %vm1081_vm10 = vcmp.gt.f32.partialorder %v4606_v23, 0.0 }
 0x1ae   : > { %v3844_v57 = vpop.eup %3843  ;;  %v4656_v19 = vpop.f32.mrb[16].mxu0  ;;  %v1217_v61 = vmul.f32 1.442695, %v1131_v28  ;;  %v3433_v29 = vadd.f32 -1.0, %v3842_v50  ;;  %v1384_v44 = vsel %vm1064_vm13, %v4532_v11, %v3451_v13  ;;  %v1147_v50 = vmin.f32 %v4608_v24, 0.0 }
 0x1af   : > { %v4658_v18 = vpop.f32.mrb[16].mxu1  ;;  %v4661_v30 = vpop.f32.mrb[17].mxu0  ;;  %v3435_v31 = vadd.f32 -1.0, %v3844_v57  ;;  %v1215_v57 = vmul.f32 1.442695, %v1130_v25  ;;  %v1146_v25 = vmin.f32 %v4611_v26, 0.0 }
 0x1b0   : > { %v4664_v35 = vpop.f32.mrb[17].mxu1  ;;  %v3846_v36 = vpop.eup %3845  ;;  %3859 = vpow2.f32 %v1217_v61  ;;  %v1366_v3 = vsel %vm1046_vm11, %v4521_v5, %v3433_v29  ;;  %v1249_v1 = vmul.f32 1.442695, %v1147_v50  ;;  %vm1083_vm11 = vcmp.gt.f32.partialorder %v4608_v24, 0.0 }
 0x1b1   : > { %v3848_v40 = vpop.eup %3847  ;;  %3861 = vpow2.f32 %v1183_v22  ;;  %v1368_v11 = vsel %vm1048_vm14, %v4523_v6, %v3435_v31  ;;  %v1219_v22 = vmul.f32 1.442695, %v1132_v37  ;;  %v3622_v16 = vpack.c.bf16 %v1382_v43, %v1366_v3 }
 0x1b2   : > { %v4672_v53 = vpop.f32.mrb[18].mxu0  ;;  %v3850_v54 = vpop.eup %3849  ;;  %3863 = vpow2.f32 %v1187_v34  ;;  %v3630_v59 = vpack.c.bf16 %v1384_v44, %v1368_v11  ;;  %v3465_v9 = vadd.f32 -1.0, %v3846_v36  ;;  %v1148_v6 = vmin.f32 %v4613_v27, 0.0 }
 0x1b3   : > { %v4676_v28 = vpop.f32.mrb[18].mxu1  ;;  %v4678_v61 = vpop.f32.mrb[19].mxu0  ;;  %v3436_v5 = vadd.f32 -1.0, %v3850_v54  ;;  %3865 = vpow2.f32 %v1245_v47  ;;  %v3467_v34 = vadd.f32 -1.0, %v3848_v40  ;;  %3623 = vmatprep.subr.bf16.mxu0 %v3622_v16  ;;  %v1161_v36 = vmin.f32 %v4620_v38, 0.0 }
 0x1b4   : > { %v3852_v4 = vpop.eup %3851  ;;  %v4684_v13 = vpop.f32.mrb[19].mxu1  ;;  %3867 = vpow2.f32 %v1215_v57  ;;  %3631 = vmatprep.subr.bf16.mxu1 %v3630_v59  ;;  %3625 = vmatpush1.bf16.msra.mxu0 %v3624_v15  ;;  %v6043_v40 = vpack.c.bf16 %v4602_v60, %v4597_v14  ;;  %v1163_v59 = vmin.f32 %v4622_v39, 0.0  ;;  %v1247_v54 = vmul.f32 1.442695, %v1146_v25 }
 0x1b5   : > { %v3854_v10 = vpop.eup %3853  ;;  %v3481_v47 = vadd.f32 -1.0, %v3852_v4  ;;  %3869 = vpow2.f32 %v1249_v1  ;;  %v1277_v57 = vmul.f32 1.442695, %v1161_v36  ;;  %v4714_v4 = vsel %vm1049_vm15, %v4559_v41, %v3436_v5  ;;  %v2551_v36 = vpop.permute.xlu0 %2550 }
 0x1b6   : > { %v4691_v29 = vpop.f32.mrb[20].mxu0  ;;  %v4693_v31 = vpop.f32.mrb[20].mxu1  ;;  %3633 = vmatpush1.bf16.msra.mxu1 %v6043_v40  ;;  %3871 = vpow2.f32 %v1219_v22  ;;  %v3438_v3 = vadd.f32 -1.0, %v3854_v10  ;;  %v1251_v11 = vmul.f32 1.442695, %v1148_v6  ;;  %v1162_v60 = vmin.f32 %v4626_v48, 0.0 }
 0x1b7   : > { %v4699_v37 = vpop.f32.mrb[21].mxu0  ;;  %v4701_v43 = vpop.f32.mrb[21].mxu1  ;;  %v1281_v7 = vmul.f32 1.442695, %v1163_v59  ;;  %3873 = vpow2.f32 %v1277_v57  ;;  %v1117_v1 = vmin.f32 %v4656_v19, 0.0  ;;  %v1119_v59 = vmin.f32 %v4658_v18, 0.0 }
 0x1b8   : > { %v3856_v44 = vpop.eup %3855  ;;  %2562 = vxpose.xlu1.b32.start [1/4] (short) (narrow) %v2551_v36, 8  ;;  %vm1097_vm12 = vcmp.gt.f32.partialorder %v4620_v38, 0.0  ;;  %vm1099_vm13 = vcmp.gt.f32.partialorder %v4622_v39, 0.0  ;;  %vm1066_vm14 = vcmp.gt.f32.partialorder %v4579_v62, 0.0  ;;  %vm1068_vm15 = vcmp.gt.f32.partialorder %v4581_v63, 0.0 }
 0x1b9   : > { %v3858_v16 = vpop.eup %3857  ;;  %v3452_v50 = vadd.f32 -1.0, %v3856_v44  ;;  %3875 = vpow2.f32 %v1281_v7  ;;  %v1164_v44 = vmin.f32 %v4628_v49, 0.0  ;;  %v1189_v40 = vmul.f32 1.442695, %v1117_v1 }
 0x1ba   : > { %v4716_v8 = vpop.f32.mrb[22].mxu0  ;;  %v3860_v15 = vpop.eup %3859  ;;  %v3483_v10 = vadd.f32 -1.0, %v3858_v16  ;;  %3877 = vpow2.f32 %v1247_v54  ;;  %v4738_v16 = vsel %vm1051_vm0, %v4561_v42, %v3438_v3  ;;  %v1414_v42 = vsel %vm1094_vm2, %v4554_v32, %v3481_v47 }
 0x1bb   : > { %v4721_v14 = vsel %vm1065_vm5, %v4574_v55, %v3452_v50  ;;  %v4725_v22 = vpop.f32.mrb[22].mxu1  ;;  %v4727_v41 = vpop.f32.mrb[23].mxu0  ;;  %v3454_v5 = vadd.f32 -1.0, %v3860_v15  ;;  %3879 = vpow2.f32 %v1251_v11  ;;  %v1398_v15 = vsel %vm1078_vm1, %v4541_v20, %v3465_v9 }
 0x1bc   : > { %v4731_v6 = vpop.f32.mrb[23].mxu1  ;;  %v3862_v55 = vpop.eup %3861  ;;  %v1279_v1 = vmul.f32 1.442695, %v1162_v60  ;;  %v1416_v20 = vsel %vm1096_vm4, %v4556_v33, %v3483_v10  ;;  %v1193_v25 = vmul.f32 1.442695, %v1119_v59  ;;  %3881 = vpow2.f32 %v1189_v40 }
 0x1bd   : > { %v3864_v50 = vpop.eup %3863  ;;  %v4744_v57 = vsel %vm1067_vm6, %v4576_v56, %v3454_v5  ;;  %v1400_v5 = vsel %vm1080_vm3, %v4543_v21, %v3467_v34  ;;  %v3437_v9 = vadd.f32 -1.0, %v3862_v55  ;;  %v2553_v32 = vpop.permute.xlu1 %2552  ;;  %v1283_v60 = vmul.f32 1.442695, %v1164_v44 }
 0x1be   : > { %v4746_v54 = vpop.f32.mrb[24].mxu0  ;;  %v4748_v7 = vpop.f32.mrb[24].mxu1  ;;  %2563 = vxpose.xlu1.b32.cont [2/4] (short) (narrow) %v2553_v32, 8  ;;  %v3439_v12 = vadd.f32 -1.0, %v3864_v50  ;;  %v3626_v21 = vpack.c.bf16 %v1414_v42, %v1398_v15  ;;  %3883 = vpow2.f32 %v1279_v1  ;;  %v1118_v44 = vmin.f32 %v4661_v30, 0.0 }
 0x1bf   : > { %v4758_v36 = vpop.f32.mrb[25].mxu0  ;;  %v4760_v56 = vpop.f32.mrb[25].mxu1  ;;  %v3634_v40 = vpack.c.bf16 %v1416_v20, %v1400_v5  ;;  %v4786_v15 = vsel %vm1050_vm8, %v4564_v45, %v3437_v9  ;;  %3885 = vpow2.f32 %v1193_v25  ;;  %v1120_v42 = vmin.f32 %v4664_v35, 0.0 }
 0x1c0   : > { %v3866_v11 = vpop.eup %3865  ;;  %3627 = vmatprep.subr.bf16.mxu0 %v3626_v21  ;;  %v1133_v1 = vmin.f32 %v4672_v53, 0.0  ;;  %vm1082_vm0 = vcmp.gt.f32.partialorder %v4611_v26, 0.0  ;;  %3887 = vpow2.f32 %v1283_v60  ;;  %v6046_v20 = vpack.c.bf16 %v4638_v52, %v4633_v51 }
 0x1c1   : > { %v3868_v47 = vpop.eup %3867  ;;  %v3468_v55 = vadd.f32 -1.0, %v3866_v11  ;;  %3635 = vmatprep.subr.bf16.mxu1 %v3634_v40  ;;  %v1135_v45 = vmin.f32 %v4676_v28, 0.0  ;;  %vm1084_vm1 = vcmp.gt.f32.partialorder %v4613_v27, 0.0  ;;  %vm1053_vm2 = vcmp.gt.f32.partialorder %v4656_v19, 0.0 }
 0x1c2   : > { %v3870_v3 = vpop.eup %3869  ;;  %v4773_v33 = vpop.f32.mrb[26].mxu0  ;;  %v3453_v32 = vadd.f32 -1.0, %v3868_v47  ;;  %3629 = vmatpush1.bf16.msra.mxu0 %v6046_v20  ;;  %v1134_v47 = vmin.f32 %v4678_v61, 0.0  ;;  %vm1055_vm3 = vcmp.gt.f32.partialorder %v4658_v18, 0.0  ;;  %vm1098_vm4 = vcmp.gt.f32.partialorder %v4626_v48, 0.0 }
 0x1c3   : > { %v4775_v34 = vpop.f32.mrb[26].mxu1  ;;  %v3872_v10 = vpop.eup %3871  ;;  %v3470_v5 = vadd.f32 -1.0, %v3870_v3  ;;  %v1221_v3 = vmul.f32 1.442695, %v1133_v1  ;;  %v4806_v51 = vsel %vm1081_vm10, %v4606_v23, %v3468_v55  ;;  %v1225_v20 = vmul.f32 1.442695, %v1135_v45 }
 0x1c4   : > { %v4779_v59 = vpop.f32.mrb[27].mxu0  ;;  %v4781_v50 = vpop.f32.mrb[27].mxu1  ;;  %v3455_v25 = vadd.f32 -1.0, %v3872_v10  ;;  %v1191_v10 = vmul.f32 1.442695, %v1118_v44  ;;  %v6048_v1 = vmov 0.0   ;;  %v1372_v45 = vsel %vm1052_vm9, %v4566_v46, %v3439_v12 }
 0x1c5   : > { %6044 = vst [vmem:[#allocation12_spill] sm:$0xff] %v4779_v59  ;;  %6045 = vst [vmem:[#allocation13_spill] sm:$0xff] %v4781_v50  ;;  %v3874_v11 = vpop.eup %3873  ;;  %v6047_v50 = vpack.c.bf16 %v4651_v17, %v4644_v58  ;;  %v1195_v17 = vmul.f32 1.442695, %v1120_v42  ;;  %3889 = vpow2.f32 %v1221_v3  ;;  %3496 = vmatmul.mubr.msk.f32.vlgmr.msra.gmra.mrb[32].mxu0 %vm1445_vm7, %v4334_v0  ;;  %v4825_v44 = vsel %vm1083_vm11, %v4608_v24, %v3470_v5 }
 0x1c6   : > { %v3876_v9 = vpop.eup %3875  ;;  %v3484_v21 = vadd.f32 -1.0, %v3874_v11  ;;  %v4801_v60 = vpop.f32.mrb[28].mxu0  ;;  %3891 = vpow2.f32 %v1225_v20  ;;  %1524 = vmatprep.mubr.f32.mxu0 %v6048_v1  ;;  %v1386_v46 = vsel %vm1066_vm14, %v4579_v62, %v3453_v32  ;;  %vm1100_vm5 = vcmp.gt.f32.partialorder %v4628_v49, 0.0 }
 0x1c7   : > { %3637 = vmatpush1.bf16.msra.mxu1 %v6047_v50  ;;  %v3878_v40 = vpop.eup %3877  ;;  %v3486_v52 = vadd.f32 -1.0, %v3876_v9  ;;  %v4808_v59 = vpop.f32.mrb[28].mxu1  ;;  %v1136_v50 = vmin.f32 %v4684_v13, 0.0  ;;  %v1223_v9 = vmul.f32 1.442695, %v1134_v47  ;;  %3893 = vpow2.f32 %v1191_v10 }
 0x1c8   : > { %v3880_v11 = vpop.eup %3879  ;;  %v4813_v58 = vsel %vm1097_vm12, %v4620_v38, %v3484_v21  ;;  %v4818_v23 = vpop.f32.mrb[29].mxu0  ;;  %v3469_v24 = vadd.f32 -1.0, %v3878_v40  ;;  %3895 = vpow2.f32 %v1195_v17  ;;  %v1151_v40 = vmin.f32 %v4693_v31, 0.0 }
 0x1c9   : > { %v4820_v55 = vpop.f32.mrb[29].mxu1  ;;  %v4832_v42 = vsel %vm1099_vm13, %v4622_v39, %v3486_v52  ;;  %v3882_v3 = vpop.eup %3881  ;;  %v3471_v52 = vadd.f32 -1.0, %v3880_v11  ;;  %v1227_v47 = vmul.f32 1.442695, %v1136_v50  ;;  %3497 = vmatmul.mubr.msk.f32.gmra.mrb[34].mxu0 %vm1445_vm7, %v4341_v2  ;;  %v1388_v10 = vsel %vm1068_vm15, %v4581_v63, %v3455_v25 }
 0x1ca   : > { %3500 = vmatmul.mubr.msk.f32.vlgmr.msra.gmra.mrb[32].mxu1 %vm1445_vm7, %v4334_v0  ;;  %v4843_v21 = vpop.f32.mrb[30].mxu0  ;;  %v4845_v39 = vpop.f32.mrb[30].mxu1  ;;  %v1149_v0 = vmin.f32 %v4691_v29, 0.0  ;;  %v1150_v38 = vmin.f32 %v4699_v37, 0.0  ;;  %1530 = vmatprep.mubr.f32.mxu0 %v6048_v1  ;;  %v4874_v32 = vsel %vm1082_vm0, %v4611_v26, %v3469_v24  ;;  %v3440_v63 = vadd.f32 -1.0, %v3882_v3 }
 0x1cb   : > { %1613 = vmatprep.mubr.f32.mxu1 %v6048_v1  ;;  %v4849_v20 = vpop.f32.mrb[31].mxu0  ;;  %v4851_v12 = vpop.f32.mrb[31].mxu1  ;;  %3897 = vpow2.f32 %v1223_v9  ;;  %v1257_v25 = vmul.f32 1.442695, %v1151_v40  ;;  %v4881_v50 = vsel %vm1084_vm1, %v4613_v27, %v3471_v52  ;;  %vm1069_vm6 = vcmp.gt.f32.partialorder %v4672_v53, 0.0 }
 0x1cc   : > { %6049 = vst [vmem:[#allocation14_spill] sm:$0xff] %v4851_v12  ;;  %v3884_v11 = vpop.eup %3883  ;;  %v1253_v5 = vmul.f32 1.442695, %v1149_v0  ;;  %v4864_v12 = vld [vmem:[#allocation2 + $0x8] sm:$0xff]  ;;  %v4869_v62 = vpop.permute.xlu1 %1434  ;;  %v1152_v26 = vmin.f32 %v4701_v43, 0.0  ;;  %v3638_v24 = vpack.c.bf16 %v1386_v46, %v4786_v15  ;;  %vm1071_vm8 = vcmp.gt.f32.partialorder %v4676_v28, 0.0 }
 0x1cd   : > { %v3886_v2 = vpop.eup %3885  ;;  %3899 = vpow2.f32 %v1227_v47  ;;  %v1255_v9 = vmul.f32 1.442695, %v1150_v38  ;;  %v3646_v3 = vpack.c.bf16 %v1388_v10, %v1372_v45  ;;  %v4888_v0 = vld [vmem:[#allocation2 + $0x10] sm:$0xff]  ;;  %v3485_v27 = vadd.f32 -1.0, %v3884_v11  ;;  %v4895_v15 = vpop.permute.xlu0 %1430 }
 0x1ce   : > { %3501 = vmatmul.mubr.msk.f32.gmra.mrb[34].mxu1 %vm1445_vm7, %v4864_v12  ;;  %v3888_v17 = vpop.eup %3887  ;;  %3498 = vmatmul.mubr.msk.f32.gmra.mrb[36].mxu0 %vm1445_vm7, %v4888_v0  ;;  %v3442_v52 = vadd.f32 -1.0, %v3886_v2  ;;  %3901 = vpow2.f32 %v1253_v5  ;;  %v1165_v40 = vmin.f32 %v4716_v8, 0.0  ;;  %v4900_v38 = vsel %vm1053_vm2, %v4656_v19, %v3440_v63 }
 0x1cf   : > { %1619 = vmatprep.mubr.f32.mxu1 %v6048_v1  ;;  %3639 = vmatprep.subr.bf16.mxu0 %v3638_v24  ;;  %v3890_v46 = vpop.eup %3889  ;;  %v3487_v47 = vadd.f32 -1.0, %v3888_v17  ;;  %3903 = vpow2.f32 %v1257_v25  ;;  %v6050_v45 = vpack.c.bf16 %v4721_v14, %v4714_v4  ;;  %v1167_v5 = vmin.f32 %v4725_v22, 0.0 }
 0x1d0   : > { %3647 = vmatprep.subr.bf16.mxu1 %v3646_v3  ;;  %v3892_v11 = vpop.eup %3891  ;;  %vm1054_vm9 = vcmp.gt.f32.partialorder %v4661_v30, 0.0  ;;  %v3456_v10 = vadd.f32 -1.0, %v3890_v46  ;;  %v1259_v2 = vmul.f32 1.442695, %v1152_v26  ;;  %v6051_v17 = vpack.c.bf16 %v4744_v57, %v4738_v16  ;;  %1536 = vmatprep.mubr.f32.mxu0 %v6048_v1  ;;  %v2555_v63 = vpop.permute.xlu1 %2554  ;;  %v4915_v26 = vld [vmem:[#allocation2 + $0x18] sm:$0xff] }
 0x1d1   : > { %3641 = vmatpush1.bf16.msra.mxu0 %v6050_v45  ;;  %v1285_v24 = vmul.f32 1.442695, %v1165_v40  ;;  %v1166_v19 = vmin.f32 %v4727_v41, 0.0  ;;  %vm1056_vm10 = vcmp.gt.f32.partialorder %v4664_v35, 0.0  ;;  %v3458_v4 = vadd.f32 -1.0, %v3892_v11  ;;  %v3894_v16 = vpop.eup %3893  ;;  %2564 = vxpose.xlu1.b32.cont [3/4] (short) (narrow) %v2555_v63, 8 }
 0x1d2   : > { %3502 = vmatmul.mubr.msk.f32.gmra.mrb[36].mxu1 %vm1445_vm7, %v4888_v0  ;;  %3905 = vpow2.f32 %v1255_v9  ;;  %v1289_v14 = vmul.f32 1.442695, %v1167_v5  ;;  %v1168_v25 = vmin.f32 %v4731_v6, 0.0  ;;  %3499 = vmatmul.mubr.msk.f32.gmra.mrb[38].mxu0 %vm1445_vm7, %v4915_v26  ;;  %v4922_v57 = vsel %vm1055_vm3, %v4658_v18, %v3442_v52  ;;  %v3896_v40 = vpop.eup %3895  ;;  %v2557_v5 = vpop.permute.xlu0 %2556 }
 0x1d3   : > { %3649 = vmatpush1.bf16.msra.mxu1 %v6051_v17  ;;  %1625 = vmatprep.mubr.f32.mxu1 %v6048_v1  ;;  %v4927_v9 = vsel %vm1069_vm6, %v4672_v53, %v3456_v10  ;;  %3907 = vpow2.f32 %v1285_v24  ;;  %v1287_v3 = vmul.f32 1.442695, %v1166_v19  ;;  %v4937_v18 = vsel %vm1071_vm8, %v4676_v28, %v3458_v4 }
 0x1d4   : > { %1696 = vmatprep.mubr.f32.mxu0 %v6048_v1  ;;  %v3656_v46 = vpack.c.bf16 %v4927_v9, %v4900_v38  ;;  %3909 = vpow2.f32 %v1289_v14  ;;  %v1291_v52 = vmul.f32 1.442695, %v1168_v25  ;;  %v1418_v53 = vsel %vm1098_vm4, %v4626_v48, %v3485_v27 }
 0x1d5   : > { %v3664_v45 = vpack.c.bf16 %v4937_v18, %v4922_v57  ;;  %vm1070_vm11 = vcmp.gt.f32.partialorder %v4678_v61, 0.0  ;;  %3911 = vpow2.f32 %v1259_v2  ;;  %v3898_v11 = vpop.eup %3897  ;;  %v1420_v28 = vsel %vm1100_vm5, %v4628_v49, %v3487_v47  ;;  %2565 = vxpose.xlu1.b32.end [4/4] (short) (narrow) %v2557_v5, 8 }
 0x1d6   : > { %3503 = vmatmul.mubr.msk.f32.gmra.mrb[38].mxu1 %vm1445_vm7, %v4915_v26  ;;  %v3441_v10 = vadd.f32 -1.0, %v3894_v16  ;;  %3913 = vpow2.f32 %v1287_v3  ;;  %v1121_v17 = vmin.f32 %v4746_v54, 0.0  ;;  %v3443_v24 = vadd.f32 -1.0, %v3896_v40 }
 0x1d7   : > { %1785 = vmatprep.mubr.f32.mxu1 %v6048_v1  ;;  %3915 = vpow2.f32 %v1291_v52  ;;  %v1123_v48 = vmin.f32 %v4748_v7, 0.0  ;;  %v1122_v27 = vmin.f32 %v4758_v36, 0.0  ;;  %v3900_v19 = vpop.eup %3899  ;;  %vm1085_vm12 = vcmp.gt.f32.partialorder %v4691_v29, 0.0 }
 0x1d8   : > { %vm1087_vm13 = vcmp.gt.f32.partialorder %v4693_v31, 0.0  ;;  %v1197_v2 = vmul.f32 1.442695, %v1121_v17  ;;  %v1124_v63 = vmin.f32 %v4760_v56, 0.0  ;;  %v3902_v49 = vpop.eup %3901  ;;  %v3457_v47 = vadd.f32 -1.0, %v3898_v11 }
 0x1d9   : > { %v1201_v4 = vmul.f32 1.442695, %v1123_v48  ;;  %v1199_v14 = vmul.f32 1.442695, %v1122_v27  ;;  %v3642_v25 = vpack.c.bf16 %v1418_v53, %v4874_v32  ;;  %v3904_v16 = vpop.eup %3903  ;;  %v4959_v3 = vsel %vm1054_vm9, %v4661_v30, %v3441_v10  ;;  %v6054_v27 = vld [vmem:[#allocation12_spill] sm:$0xff] }
 0x1da   : > { %vm1072_vm14 = vcmp.gt.f32.partialorder %v4684_v13, 0.0  ;;  %vm1086_vm15 = vcmp.gt.f32.partialorder %v4699_v37, 0.0  ;;  %3917 = vpow2.f32 %v1197_v2  ;;  %v1203_v40 = vmul.f32 1.442695, %v1124_v63 }
 0x1db   : > { %v4966_v52 = vsel %vm1056_vm10, %v4664_v35, %v3443_v24  ;;  %vm1101_vm0 = vcmp.gt.f32.partialorder %v4716_v8, 0.0  ;;  %3919 = vpow2.f32 %v1201_v4  ;;  %3643 = vmatprep.subr.bf16.mxu0 %v3642_v25  ;;  %v3650_v32 = vpack.c.bf16 %v1420_v28, %v4881_v50  ;;  %v6055_v4 = vld [vmem:[#allocation13_spill] sm:$0xff]  ;;  %v4989_v25 = vld [vmem:[#allocation2] sm:$0xff] }
 0x1dc   : > { %v3906_v53 = vpop.eup %3905  ;;  %v3472_v30 = vadd.f32 -1.0, %v3902_v49  ;;  %vm1103_vm1 = vcmp.gt.f32.partialorder %v4725_v22, 0.0  ;;  %3921 = vpow2.f32 %v1199_v14  ;;  %v6052_v5 = vpack.c.bf16 %v4813_v58, %v4806_v51 }
 0x1dd   : > { %v1137_v11 = vmin.f32 %v4773_v33, 0.0  ;;  %v3908_v10 = vpop.eup %3907  ;;  %v4978_v35 = vsel %vm1070_vm11, %v4678_v61, %v3457_v47  ;;  %v3474_v17 = vadd.f32 -1.0, %v3904_v16  ;;  %vm1088_vm2 = vcmp.gt.f32.partialorder %v4701_v43, 0.0  ;;  %3651 = vmatprep.subr.bf16.mxu1 %v3650_v32 }
 0x1de   : > { %3645 = vmatpush1.bf16.msra.mxu0 %v6052_v5  ;;  %3923 = vpow2.f32 %v1203_v40  ;;  %v1139_v50 = vmin.f32 %v4775_v34, 0.0  ;;  %v3910_v28 = vpop.eup %3909  ;;  %v3459_v24 = vadd.f32 -1.0, %v3900_v19  ;;  %v3488_v48 = vadd.f32 -1.0, %v3908_v10 }
 0x1df   : > { %v6053_v51 = vpack.c.bf16 %v4832_v42, %v4825_v44  ;;  %v1229_v58 = vmul.f32 1.442695, %v1137_v11  ;;  %v1138_v2 = vmin.f32 %v6054_v27, 0.0  ;;  %v3912_v63 = vpop.eup %3911  ;;  %v3473_v61 = vadd.f32 -1.0, %v3906_v53 }
 0x1e0   : > { %v3490_v49 = vadd.f32 -1.0, %v3910_v28  ;;  %vm1102_vm3 = vcmp.gt.f32.partialorder %v4727_v41, 0.0  ;;  %vm1104_vm4 = vcmp.gt.f32.partialorder %v4731_v6, 0.0  ;;  %v1233_v47 = vmul.f32 1.442695, %v1139_v50  ;;  %v3914_v44 = vpop.eup %3913 }
 0x1e1   : > { %3653 = vmatpush1.bf16.msra.mxu1 %v6053_v51  ;;  %v1140_v14 = vmin.f32 %v6055_v4, 0.0  ;;  %3504 = vmatmul.mubr.msk.f32.vlgmr.msra.gmra.mrb[40].mxu0 %vm1445_vm7, %v4989_v25  ;;  %v4996_v42 = vsel %vm1085_vm12, %v4691_v29, %v3472_v30  ;;  %v5001_v19 = vsel %vm1101_vm0, %v4716_v8, %v3488_v48  ;;  %vm1057_vm5 = vcmp.gt.f32.partialorder %v4746_v54, 0.0  ;;  %v3916_v40 = vpop.eup %3915 }
 0x1e2   : > { %vm1059_vm6 = vcmp.gt.f32.partialorder %v4748_v7, 0.0  ;;  %3925 = vpow2.f32 %v1229_v58  ;;  %v1231_v16 = vmul.f32 1.442695, %v1138_v2  ;;  %1702 = vmatprep.mubr.f32.mxu0 %v6048_v1  ;;  %v5009_v32 = vsel %vm1087_vm13, %v4693_v31, %v3474_v17 }
 0x1e3   : > { %v3660_v29 = vpack.c.bf16 %v5001_v19, %v4996_v42  ;;  %v5016_v8 = vsel %vm1103_vm1, %v4725_v22, %v3490_v49  ;;  %vm1058_vm8 = vcmp.gt.f32.partialorder %v4758_v36, 0.0  ;;  %3927 = vpow2.f32 %v1233_v47 }
 0x1e4   : > { %3508 = vmatmul.mubr.msk.f32.vlgmr.msra.gmra.mrb[40].mxu1 %vm1445_vm7, %v4989_v25  ;;  %v3475_v53 = vadd.f32 -1.0, %v3912_v63  ;;  %v3668_v30 = vpack.c.bf16 %v5016_v8, %v5009_v32  ;;  %3929 = vpow2.f32 %v1231_v16  ;;  %v1235_v31 = vmul.f32 1.442695, %v1140_v14  ;;  %v3918_v17 = vpop.eup %3917 }
 0x1e5   : > { %1791 = vmatprep.mubr.f32.mxu1 %v6048_v1  ;;  %v1392_v5 = vsel %vm1072_vm14, %v4684_v13, %v3459_v24  ;;  %v5030_v22 = vsel %vm1086_vm15, %v4699_v37, %v3473_v61  ;;  %v3489_v11 = vadd.f32 -1.0, %v3914_v44  ;;  %v1153_v10 = vmin.f32 %v4801_v60, 0.0  ;;  %3505 = vmatmul.mubr.msk.f32.gmra.mrb[42].mxu0 %vm1445_vm7, %v4864_v12  ;;  %v3920_v13 = vpop.eup %3919 }
 0x1e6   : > { %v3491_v50 = vadd.f32 -1.0, %v3916_v40  ;;  %3931 = vpow2.f32 %v1235_v31  ;;  %v1155_v28 = vmin.f32 %v4808_v59, 0.0  ;;  %v1154_v48 = vmin.f32 %v4818_v23, 0.0  ;;  %1708 = vmatprep.mubr.f32.mxu0 %v6048_v1  ;;  %v3922_v58 = vpop.eup %3921 }
 0x1e7   : > { %v3444_v24 = vadd.f32 -1.0, %v3918_v17  ;;  %vm1073_vm9 = vcmp.gt.f32.partialorder %v4773_v33, 0.0  ;;  %v1261_v37 = vmul.f32 1.442695, %v1153_v10  ;;  %v1156_v51 = vmin.f32 %v4820_v55, 0.0  ;;  %v6056_v10 = vld [vmem:[#allocation14_spill] sm:$0xff] }
 0x1e8   : > { %3509 = vmatmul.mubr.msk.f32.gmra.mrb[42].mxu1 %vm1445_vm7, %v4864_v12  ;;  %v5045_v2 = vsel %vm1088_vm2, %v4701_v43, %v3475_v53  ;;  %v3446_v63 = vadd.f32 -1.0, %v3920_v13  ;;  %v1265_v61 = vmul.f32 1.442695, %v1155_v28  ;;  %v3654_v49 = vpack.c.bf16 %v4978_v35, %v4959_v3  ;;  %v3924_v47 = vpop.eup %3923 }
 0x1e9   : > { %1797 = vmatprep.mubr.f32.mxu1 %v6048_v1  ;;  %v3445_v14 = vadd.f32 -1.0, %v3922_v58  ;;  %vm1075_vm10 = vcmp.gt.f32.partialorder %v4775_v34, 0.0  ;;  %vm1074_vm11 = vcmp.gt.f32.partialorder %v6054_v27, 0.0  ;;  %v1263_v44 = vmul.f32 1.442695, %v1154_v48  ;;  %3506 = vmatmul.mubr.msk.f32.gmra.mrb[44].mxu0 %vm1445_vm7, %v4888_v0 }
 0x1ea   : > { %v1422_v43 = vsel %vm1102_vm3, %v4727_v41, %v3489_v11  ;;  %v1424_v3 = vsel %vm1104_vm4, %v4731_v6, %v3491_v50  ;;  %vm1060_vm12 = vcmp.gt.f32.partialorder %v4760_v56, 0.0  ;;  %vm1076_vm13 = vcmp.gt.f32.partialorder %v6055_v4, 0.0  ;;  %3655 = vmatprep.subr.bf16.mxu0 %v3654_v49  ;;  %1714 = vmatprep.mubr.f32.mxu0 %v6048_v1 }
 0x1eb   : > { %v1267_v35 = vmul.f32 1.442695, %v1156_v51  ;;  %v3662_v16 = vpack.c.bf16 %v1392_v5, %v4966_v52  ;;  %v5067_v40 = vsel %vm1057_vm5, %v4746_v54, %v3444_v24  ;;  %v5072_v41 = vsel %vm1059_vm6, %v4748_v7, %v3446_v63  ;;  %3657 = vmatpush1.bf16.msra.mxu0 %v3656_v46 }
 0x1ec   : > { %3933 = vpow2.f32 %v1261_v37  ;;  %v1169_v6 = vmin.f32 %v4843_v21, 0.0  ;;  %3510 = vmatmul.mubr.msk.f32.gmra.mrb[44].mxu1 %vm1445_vm7, %v4888_v0  ;;  %v3926_v52 = vpop.eup %3925  ;;  %v1378_v54 = vsel %vm1058_vm8, %v4758_v36, %v3445_v14  ;;  %v3447_v53 = vadd.f32 -1.0, %v3924_v47 }
 0x1ed   : > { %3935 = vpow2.f32 %v1265_v61  ;;  %3663 = vmatprep.subr.bf16.mxu1 %v3662_v16  ;;  %v1171_v7 = vmin.f32 %v4845_v39, 0.0  ;;  %1803 = vmatprep.mubr.f32.mxu1 %v6048_v1  ;;  %v3928_v31 = vpop.eup %3927  ;;  %v3460_v38 = vadd.f32 -1.0, %v3926_v52  ;;  %v1170_v46 = vmin.f32 %v4849_v20, 0.0 }
 0x1ee   : > { %3937 = vpow2.f32 %v1263_v44  ;;  %3665 = vmatpush1.bf16.msra.mxu1 %v3664_v45  ;;  %v1293_v9 = vmul.f32 1.442695, %v1169_v6  ;;  %3507 = vmatmul.mubr.msk.f32.gmra.mrb[46].mxu0 %vm1445_vm7, %v4915_v26  ;;  %v3930_v36 = vpop.eup %3929  ;;  %v3462_v5 = vadd.f32 -1.0, %v3928_v31  ;;  %v1172_v17 = vmin.f32 %v6056_v10, 0.0 }
 0x1ef   : > { %3939 = vpow2.f32 %v1267_v35  ;;  %v1297_v11 = vmul.f32 1.442695, %v1171_v7  ;;  %1874 = vmatprep.mubr.f32.mxu0 %v6048_v1  ;;  %v1393_v50 = vsel %vm1073_vm9, %v4773_v33, %v3460_v38  ;;  %v3461_v57 = vadd.f32 -1.0, %v3930_v36 }
 0x1f0   : > { %3941 = vpow2.f32 %v1293_v9  ;;  %v1295_v18 = vmul.f32 1.442695, %v1170_v46  ;;  %3511 = vmatmul.mubr.msk.f32.gmra.mrb[46].mxu1 %vm1445_vm7, %v4915_v26  ;;  %v3932_v45 = vpop.eup %3931  ;;  %v3672_v28 = vpack.c.bf16 %v1393_v50, %v5067_v40  ;;  %v1395_v48 = vsel %vm1075_vm10, %v4775_v34, %v3462_v5  ;;  %v5208_v50 = vpop.permute.xlu1 %1438 }
 0x1f1   : > { %3943 = vpow2.f32 %v1297_v11  ;;  %v1299_v13 = vmul.f32 1.442695, %v1172_v17  ;;  %1963 = vmatprep.mubr.f32.mxu1 %v6048_v1  ;;  %v3680_v24 = vpack.c.bf16 %v1395_v48, %v5072_v41  ;;  %v1394_v33 = vsel %vm1074_vm11, %v6054_v27, %v3461_v57 }
 0x1f2   : > { %v3463_v37 = vadd.f32 -1.0, %v3932_v45  ;;  %3945 = vpow2.f32 %v1295_v18  ;;  %v3658_v51 = vpack.c.bf16 %v1422_v43, %v5030_v22  ;;  %v3666_v58 = vpack.c.bf16 %v1424_v3, %v5045_v2 }
 0x1f3   : > { %3947 = vpow2.f32 %v1299_v13  ;;  %v3670_v63 = vpack.c.bf16 %v1394_v33, %v1378_v54  ;;  %v1380_v34 = vsel %vm1060_vm12, %v4760_v56, %v3447_v53  ;;  %vm1089_vm14 = vcmp.gt.f32.partialorder %v4801_v60, 0.0 }
 0x1f4   : > { %v1396_v61 = vsel %vm1076_vm13, %v6055_v4, %v3463_v37  ;;  %3659 = vmatprep.subr.bf16.mxu0 %v3658_v51  ;;  %3667 = vmatprep.subr.bf16.mxu1 %v3666_v58  ;;  %vm1091_vm15 = vcmp.gt.f32.partialorder %v4808_v59, 0.0  ;;  %vm1090_vm0 = vcmp.gt.f32.partialorder %v4818_v23, 0.0  ;;  %vm1092_vm1 = vcmp.gt.f32.partialorder %v4820_v55, 0.0  ;;  %v5217_v51 = vpop.permute.xlu0 %1442 }
 0x1f5   : > { %v3678_v49 = vpack.c.bf16 %v1396_v61, %v1380_v34  ;;  %3661 = vmatpush1.bf16.msra.mxu0 %v3660_v29  ;;  %3669 = vmatpush1.bf16.msra.mxu1 %v3668_v30  ;;  %vm1105_vm2 = vcmp.gt.f32.partialorder %v4843_v21, 0.0  ;;  %vm1107_vm3 = vcmp.gt.f32.partialorder %v4845_v39, 0.0  ;;  %vm1106_vm4 = vcmp.gt.f32.partialorder %v4849_v20, 0.0 }
 0x1f6   : > { %v3934_v27 = vpop.eup %3933  ;;  %3671 = vmatprep.subr.bf16.mxu0 %v3670_v63  ;;  %vm1108_vm5 = vcmp.gt.f32.partialorder %v6056_v10, 0.0 }
 0x1f7   : > { %v3936_v22 = vpop.eup %3935  ;;  %3679 = vmatprep.subr.bf16.mxu1 %v3678_v49  ;;  %v3476_v47 = vadd.f32 -1.0, %v3934_v27 }
 0x1f8   : > { %v3938_v56 = vpop.eup %3937  ;;  %3512 = vmatmul.mubr.msk.f32.vlgmr.msra.gmra.mrb[48].mxu0 %vm1445_vm7, %v4989_v25  ;;  %3516 = vmatmul.mubr.msk.f32.vlgmr.msra.gmra.mrb[48].mxu1 %vm1445_vm7, %v4989_v25  ;;  %v3478_v42 = vadd.f32 -1.0, %v3936_v22 }
 0x1f9   : > { %v3940_v2 = vpop.eup %3939  ;;  %1880 = vmatprep.mubr.f32.mxu0 %v6048_v1  ;;  %1969 = vmatprep.mubr.f32.mxu1 %v6048_v1  ;;  %v3477_v32 = vadd.f32 -1.0, %v3938_v56  ;;  %v1409_v43 = vsel %vm1089_vm14, %v4801_v60, %v3476_v47 }
 0x1fa   : > { %v3942_v4 = vpop.eup %3941  ;;  %3673 = vmatpush1.bf16.msra.mxu0 %v3672_v28  ;;  %3681 = vmatpush1.bf16.msra.mxu1 %v3680_v24  ;;  %v3479_v30 = vadd.f32 -1.0, %v3940_v2  ;;  %v1411_v16 = vsel %vm1091_vm15, %v4808_v59, %v3478_v42 }
 0x1fb   : > { %v3944_v19 = vpop.eup %3943  ;;  %v3492_v29 = vadd.f32 -1.0, %v3942_v4  ;;  %v1410_v60 = vsel %vm1090_vm0, %v4818_v23, %v3477_v32 }
 0x1fc   : > { %v3946_v8 = vpop.eup %3945  ;;  %v3494_v14 = vadd.f32 -1.0, %v3944_v19  ;;  %3513 = vmatmul.mubr.msk.f32.gmra.mrb[50].mxu0 %vm1445_vm7, %v4864_v12  ;;  %3517 = vmatmul.mubr.msk.f32.gmra.mrb[50].mxu1 %vm1445_vm7, %v4864_v12  ;;  %v1412_v59 = vsel %vm1092_vm1, %v4820_v55, %v3479_v30 }
 0x1fd   : > { %v3948_v44 = vpop.eup %3947  ;;  %v1425_v3 = vsel %vm1105_vm2, %v4843_v21, %v3492_v29  ;;  %v3493_v35 = vadd.f32 -1.0, %v3946_v8  ;;  %1886 = vmatprep.mubr.f32.mxu0 %v6048_v1  ;;  %1975 = vmatprep.mubr.f32.mxu1 %v6048_v1 }
 0x1fe   : > { %v3676_v40 = vpack.c.bf16 %v1425_v3, %v1409_v43  ;;  %v1427_v41 = vsel %vm1107_vm3, %v4845_v39, %v3494_v14  ;;  %v3495_v6 = vadd.f32 -1.0, %v3948_v44 }
 0x1ff   : > { %v3684_v21 = vpack.c.bf16 %v1427_v41, %v1411_v16  ;;  %v1426_v52 = vsel %vm1106_vm4, %v4849_v20, %v3493_v35 }
 0x200   : > { %v1428_v39 = vsel %vm1108_vm5, %v6056_v10, %v3495_v6  ;;  %v3674_v54 = vpack.c.bf16 %v1426_v52, %v1410_v60  ;;  %3514 = vmatmul.mubr.msk.f32.gmra.mrb[52].mxu0 %vm1445_vm7, %v4888_v0  ;;  %3518 = vmatmul.mubr.msk.f32.gmra.mrb[52].mxu1 %vm1445_vm7, %v4888_v0 }
 0x201   : > { %v3682_v53 = vpack.c.bf16 %v1428_v39, %v1412_v59  ;;  %1892 = vmatprep.mubr.f32.mxu0 %v6048_v1  ;;  %1981 = vmatprep.mubr.f32.mxu1 %v6048_v1 }
 0x202   : > { %3675 = vmatprep.subr.bf16.mxu0 %v3674_v54 }
 0x203   : > { %3683 = vmatprep.subr.bf16.mxu1 %v3682_v53  ;;  %3677 = vmatpush1.bf16.msra.mxu0 %v3676_v40 }
 0x204   : > { %3685 = vmatpush1.bf16.msra.mxu1 %v3684_v21  ;;  %3515 = vmatmul.mubr.msk.f32.gmra.mrb[54].mxu0 %vm1445_vm7, %v4915_v26 }
 0x205   : > { %3519 = vmatmul.mubr.msk.f32.gmra.mrb[54].mxu1 %vm1445_vm7, %v4915_v26  ;;  %2052 = vmatprep.mubr.f32.mxu0 %v6048_v1 }
 0x206   : > { %2141 = vmatprep.mubr.f32.mxu1 %v6048_v1 }
 0x208   : > { %3520 = vmatmul.mubr.msk.f32.vlgmr.msra.gmra.mrb[56].mxu0 %vm1445_vm7, %v4989_v25 }
 0x209   : > { %3524 = vmatmul.mubr.msk.f32.vlgmr.msra.gmra.mrb[56].mxu1 %vm1445_vm7, %v4989_v25  ;;  %2058 = vmatprep.mubr.f32.mxu0 %v6048_v1 }
 0x20a   : > { %2147 = vmatprep.mubr.f32.mxu1 %v6048_v1 }
 0x20c   : > { %3521 = vmatmul.mubr.msk.f32.gmra.mrb[58].mxu0 %vm1445_vm7, %v4864_v12 }
 0x20d   : > { %3525 = vmatmul.mubr.msk.f32.gmra.mrb[58].mxu1 %vm1445_vm7, %v4864_v12  ;;  %2064 = vmatprep.mubr.f32.mxu0 %v6048_v1 }
 0x20e   : > { %2153 = vmatprep.mubr.f32.mxu1 %v6048_v1 }
 0x210   : > { %3522 = vmatmul.mubr.msk.f32.gmra.mrb[60].mxu0 %vm1445_vm7, %v4888_v0 }
 0x211   : > { %3526 = vmatmul.mubr.msk.f32.gmra.mrb[60].mxu1 %vm1445_vm7, %v4888_v0  ;;  %2070 = vmatprep.mubr.f32.mxu0 %v6048_v1 }
 0x212   : > { %2159 = vmatprep.mubr.f32.mxu1 %v6048_v1 }
 0x214   : > { %3523 = vmatmul.mubr.msk.f32.gmra.mrb[62].mxu0 %vm1445_vm7, %v4915_v26 }
 0x215   : > { %3527 = vmatmul.mubr.msk.f32.gmra.mrb[62].mxu1 %vm1445_vm7, %v4915_v26  ;;  %2661 = vmatprep.mubr.f32.mxu0 %v6048_v1 }
 0x216   : > { %2732 = vmatprep.mubr.f32.mxu1 %v6048_v1 }
 0x298   : > { %v1520_v23 = vpop.f32.mrb[32].mxu0 }
 0x299   : > { %v5194_v55 = vadd.f32 %v1520_v23, %v4895_v15  ;;  %v1522_v12 = vpop.f32.mrb[33].mxu0 }
 0x29a   : > { %v5220_v58 = vadd.f32 %v1522_v12, %v4895_v15 }
 0x29b   : > { %v2230_v7 = vmin.f32 %v5194_v55, 0.0  ;;  %vm2166_vm6 = vcmp.gt.f32.partialorder %v5194_v55, 0.0 }
 0x29c   : > { %v1526_v38 = vpop.f32.mrb[34].mxu0  ;;  %v2231_v32 = vmin.f32 %v5220_v58, 0.0  ;;  %vm2167_vm15 = vcmp.gt.f32.partialorder %v5220_v58, 0.0 }
 0x29d   : > { %v1609_v20 = vpop.f32.mrb[32].mxu1  ;;  %v2294_v26 = vmul.f32 1.442695, %v2230_v7  ;;  %v5202_v9 = vadd.f32 %v1526_v38, %v4869_v62  ;;  %v1528_v36 = vpop.f32.mrb[35].mxu0 }
 0x29e   : > { %v5197_v0 = vadd.f32 %v1609_v20, %v4895_v15  ;;  %v1611_v25 = vpop.f32.mrb[33].mxu1  ;;  %v5236_v42 = vadd.f32 %v1528_v36, %v4869_v62  ;;  %v2296_v40 = vmul.f32 1.442695, %v2231_v32 }
 0x29f   : > { %3949 = vpow2.f32 %v2294_v26  ;;  %v2246_v17 = vmin.f32 %v5202_v9, 0.0  ;;  %v5225_v22 = vadd.f32 %v1611_v25, %v4895_v15  ;;  %vm2182_vm9 = vcmp.gt.f32.partialorder %v5202_v9, 0.0 }
 0x2a0   : > { %v2232_v31 = vmin.f32 %v5197_v0, 0.0  ;;  %v2247_v3 = vmin.f32 %v5236_v42, 0.0  ;;  %vm2168_vm8 = vcmp.gt.f32.partialorder %v5197_v0, 0.0  ;;  %vm2183_vm1 = vcmp.gt.f32.partialorder %v5236_v42, 0.0 }
 0x2a1   : > { %v1615_v46 = vpop.f32.mrb[34].mxu1  ;;  %v1532_v18 = vpop.f32.mrb[36].mxu0  ;;  %v2326_v45 = vmul.f32 1.442695, %v2246_v17  ;;  %v2233_v44 = vmin.f32 %v5225_v22, 0.0  ;;  %vm2169_vm0 = vcmp.gt.f32.partialorder %v5225_v22, 0.0 }
 0x2a2   : > { %v2298_v5 = vmul.f32 1.442695, %v2232_v31  ;;  %v5205_v11 = vadd.f32 %v1615_v46, %v4869_v62  ;;  %v1617_v10 = vpop.f32.mrb[35].mxu1  ;;  %v1534_v48 = vpop.f32.mrb[37].mxu0  ;;  %v5212_v24 = vadd.f32 %v1532_v18, %v5208_v50  ;;  %v2328_v23 = vmul.f32 1.442695, %v2247_v3 }
 0x2a3   : > { %v5240_v8 = vadd.f32 %v1617_v10, %v4869_v62  ;;  %v5248_v41 = vadd.f32 %v1534_v48, %v5208_v50  ;;  %v2300_v39 = vmul.f32 1.442695, %v2233_v44 }
 0x2a4   : > { %3951 = vpow2.f32 %v2298_v5  ;;  %v2248_v57 = vmin.f32 %v5205_v11, 0.0  ;;  %v2262_v63 = vmin.f32 %v5212_v24, 0.0  ;;  %vm2184_vm10 = vcmp.gt.f32.partialorder %v5205_v11, 0.0 }
 0x2a5   : > { %v1621_v28 = vpop.f32.mrb[36].mxu1  ;;  %3953 = vpow2.f32 %v2326_v45  ;;  %v1538_v34 = vpop.f32.mrb[38].mxu0  ;;  %v2249_v52 = vmin.f32 %v5240_v8, 0.0  ;;  %v2263_v7 = vmin.f32 %v5248_v41, 0.0  ;;  %vm2198_vm11 = vcmp.gt.f32.partialorder %v5212_v24, 0.0 }
 0x2a6   : > { %v2330_v13 = vmul.f32 1.442695, %v2248_v57  ;;  %v5215_v33 = vadd.f32 %v1621_v28, %v5208_v50  ;;  %v1623_v37 = vpop.f32.mrb[37].mxu1  ;;  %v1540_v27 = vpop.f32.mrb[39].mxu0  ;;  %v2358_v56 = vmul.f32 1.442695, %v2262_v63  ;;  %v5228_v2 = vadd.f32 %v1538_v34, %v5217_v51 }
 0x2a7   : > { %v5255_v20 = vadd.f32 %v1623_v37, %v5208_v50  ;;  %v2332_v46 = vmul.f32 1.442695, %v2249_v52  ;;  %v2360_v18 = vmul.f32 1.442695, %v2263_v7  ;;  %vm2185_vm2 = vcmp.gt.f32.partialorder %v5240_v8, 0.0 }
 0x2a8   : > { %3955 = vpow2.f32 %v2330_v13  ;;  %v2264_v61 = vmin.f32 %v5215_v33, 0.0  ;;  %v2278_v30 = vmin.f32 %v5228_v2, 0.0  ;;  %vm2200_vm12 = vcmp.gt.f32.partialorder %v5215_v33, 0.0 }
 0x2a9   : > { %v1627_v49 = vpop.f32.mrb[38].mxu1  ;;  %v3950_v29 = vpop.eup %3949  ;;  %3957 = vpow2.f32 %v2358_v56  ;;  %vm2214_vm13 = vcmp.gt.f32.partialorder %v5228_v2, 0.0 }
 0x2aa   : > { %v5231_v47 = vadd.f32 %v1627_v49, %v5217_v51  ;;  %v5233_v4 = vpop.f32.mrb[39].mxu1  ;;  %v2362_v19 = vmul.f32 1.442695, %v2264_v61  ;;  %v2390_v35 = vmul.f32 1.442695, %v2278_v30  ;;  %v3528_v16 = vadd.f32 -1.0, %v3950_v29 }
 0x2ab   : > { %v5295_v63 = vadd.f32 %v5233_v4, %v5217_v51 }
 0x2ac   : > { %3959 = vpow2.f32 %v2362_v19  ;;  %v2280_v43 = vmin.f32 %v5231_v47, 0.0  ;;  %v5260_v12 = vsel %vm2166_vm6, %v5194_v55, %v3528_v16  ;;  %vm2216_vm14 = vcmp.gt.f32.partialorder %v5231_v47, 0.0 }
 0x2ad   : > { %3961 = vpow2.f32 %v2390_v35  ;;  %v2281_v52 = vmin.f32 %v5295_v63, 0.0 }
 0x2ae   : > { %v3952_v14 = vpop.eup %3951  ;;  %v2394_v6 = vmul.f32 1.442695, %v2280_v43 }
 0x2af   : > { %v3954_v60 = vpop.eup %3953  ;;  %v3530_v21 = vadd.f32 -1.0, %v3952_v14 }
 0x2b0   : > { %v3544_v54 = vadd.f32 -1.0, %v3954_v60  ;;  %3963 = vpow2.f32 %v2394_v6 }
 0x2b1   : > { %3965 = vpow2.f32 %v2296_v40  ;;  %v5269_v31 = vsel %vm2168_vm8, %v5197_v0, %v3530_v21  ;;  %v2265_v0 = vmin.f32 %v5255_v20, 0.0 }
 0x2b2   : > { %v3956_v59 = vpop.eup %3955  ;;  %v5263_v25 = vsel %vm2182_vm9, %v5202_v9, %v3544_v54  ;;  %3967 = vpow2.f32 %v2300_v39  ;;  %vm2199_vm9 = vcmp.gt.f32.partialorder %v5248_v41, 0.0 }
 0x2b3   : > { %v3546_v53 = vadd.f32 -1.0, %v3956_v59  ;;  %v3688_v38 = vpack.c.bf16 %v5263_v25, %v5260_v12  ;;  %v3958_v10 = vpop.eup %3957  ;;  %3969 = vpow2.f32 %v2328_v23  ;;  %v2364_v56 = vmul.f32 1.442695, %v2265_v0 }
 0x2b4   : > { %v1698_v55 = vpop.f32.mrb[40].mxu0  ;;  %3971 = vpow2.f32 %v2332_v46  ;;  %v3560_v37 = vadd.f32 -1.0, %v3958_v10 }
 0x2b5   : > { %v5274_v26 = vsel %vm2184_vm10, %v5205_v11, %v3546_v53  ;;  %v5279_v36 = vadd.f32 %v1698_v55, %v4895_v15  ;;  %v1700_v5 = vpop.f32.mrb[41].mxu0  ;;  %v5283_v11 = vadd.f32 %v1540_v27, %v5217_v51  ;;  %3973 = vpow2.f32 %v2360_v18 }
 0x2b6   : > { %v3696_v9 = vpack.c.bf16 %v5274_v26, %v5269_v31  ;;  %v3960_v57 = vpop.eup %3959  ;;  %v5299_v32 = vadd.f32 %v1700_v5, %v4895_v15  ;;  %v5312_v60 = vsel %vm2198_vm11, %v5212_v24, %v3560_v37  ;;  %v2396_v18 = vmul.f32 1.442695, %v2281_v52 }
 0x2b7   : > { %v1787_v17 = vpop.f32.mrb[40].mxu1  ;;  %v2234_v45 = vmin.f32 %v5279_v36, 0.0  ;;  %v3962_v49 = vpop.eup %3961  ;;  %v3562_v27 = vadd.f32 -1.0, %v3960_v57  ;;  %v2279_v44 = vmin.f32 %v5283_v11, 0.0  ;;  %vm2170_vm3 = vcmp.gt.f32.partialorder %v5279_v36, 0.0 }
 0x2b8   : > { %v5287_v28 = vadd.f32 %v1787_v17, %v4895_v15  ;;  %v1789_v48 = vpop.f32.mrb[41].mxu1  ;;  %v1704_v13 = vpop.f32.mrb[42].mxu0  ;;  %v3576_v14 = vadd.f32 -1.0, %v3962_v49  ;;  %vm2215_vm8 = vcmp.gt.f32.partialorder %v5283_v11, 0.0  ;;  %vm2201_vm11 = vcmp.gt.f32.partialorder %v5255_v20, 0.0 }
 0x2b9   : > { %v2302_v34 = vmul.f32 1.442695, %v2234_v45  ;;  %v1706_v61 = vpop.f32.mrb[43].mxu0  ;;  %v5303_v43 = vadd.f32 %v1704_v13, %v4869_v62  ;;  %v5326_v54 = vsel %vm2200_vm12, %v5215_v33, %v3562_v27  ;;  %v2392_v17 = vmul.f32 1.442695, %v2279_v44 }
 0x2ba   : > { %v2236_v19 = vmin.f32 %v5287_v28, 0.0  ;;  %v3964_v30 = vpop.eup %3963  ;;  %v5317_v21 = vsel %vm2214_vm13, %v5228_v2, %v3576_v14  ;;  %v2235_v2 = vmin.f32 %v5299_v32, 0.0  ;;  %v5352_v27 = vadd.f32 %v1789_v48, %v4895_v15 }
 0x2bb   : > { %v1793_v29 = vpop.f32.mrb[42].mxu1  ;;  %v3578_v3 = vadd.f32 -1.0, %v3964_v30  ;;  %3975 = vpow2.f32 %v2302_v34  ;;  %v3966_v6 = vpop.eup %3965  ;;  %v2250_v59 = vmin.f32 %v5303_v43, 0.0  ;;  %v5355_v30 = vadd.f32 %v1706_v61, %v4869_v62 }
 0x2bc   : > { %v1795_v4 = vpop.f32.mrb[43].mxu1  ;;  %v2306_v35 = vmul.f32 1.442695, %v2236_v19  ;;  %v5307_v16 = vadd.f32 %v1793_v29, %v4869_v62  ;;  %v1710_v40 = vpop.f32.mrb[44].mxu0  ;;  %v3529_v0 = vadd.f32 -1.0, %v3966_v6  ;;  %v2237_v52 = vmin.f32 %v5352_v27, 0.0 }
 0x2bd   : > { %v5321_v39 = vpop.f32.mrb[45].mxu0  ;;  %v5333_v53 = vsel %vm2216_vm14, %v5231_v47, %v3578_v3  ;;  %v3968_v7 = vpop.eup %3967  ;;  %v2334_v55 = vmul.f32 1.442695, %v2250_v59  ;;  %v5343_v47 = vadd.f32 %v1710_v40, %v5208_v50  ;;  %v2304_v29 = vmul.f32 1.442695, %v2235_v2 }
 0x2be   : > { %3977 = vpow2.f32 %v2306_v35  ;;  %v2252_v33 = vmin.f32 %v5307_v16, 0.0  ;;  %v3970_v10 = vpop.eup %3969  ;;  %v3531_v49 = vadd.f32 -1.0, %v3968_v7  ;;  %v2487_v61 = vsel %vm2167_vm15, %v5220_v58, %v3529_v0 }
 0x2bf   : > { %v1799_v23 = vpop.f32.mrb[44].mxu1  ;;  %3979 = vpow2.f32 %v2334_v55  ;;  %v3972_v34 = vpop.eup %3971  ;;  %v2266_v14 = vmin.f32 %v5343_v47, 0.0  ;;  %v3545_v3 = vadd.f32 -1.0, %v3970_v10  ;;  %v5370_v59 = vadd.f32 %v1795_v4, %v4869_v62 }
 0x2c0   : > { %v5339_v5 = vpop.f32.mrb[45].mxu1  ;;  %v2338_v45 = vmul.f32 1.442695, %v2252_v33  ;;  %v5346_v13 = vadd.f32 %v1799_v23, %v5208_v50  ;;  %3981 = vpow2.f32 %v2364_v56  ;;  %v3974_v56 = vpop.eup %3973  ;;  %v3547_v7 = vadd.f32 -1.0, %v3972_v34 }
 0x2c1   : > { %v1716_v57 = vpop.f32.mrb[46].mxu0  ;;  %v2366_v48 = vmul.f32 1.442695, %v2266_v14  ;;  %v2251_v55 = vmin.f32 %v5355_v30, 0.0  ;;  %v2489_v33 = vsel %vm2169_vm0, %v5225_v22, %v3531_v49  ;;  %v5379_v10 = vadd.f32 -1.0, %v3974_v56 }
 0x2c2   : > { %v5348_v37 = vpop.f32.mrb[47].mxu0  ;;  %3983 = vpow2.f32 %v2338_v45  ;;  %v2268_v35 = vmin.f32 %v5346_v13, 0.0  ;;  %v5363_v40 = vadd.f32 %v1716_v57, %v5217_v51  ;;  %v2503_v58 = vsel %vm2183_vm1, %v5236_v42, %v3545_v3 }
 0x2c3   : > { %v1805_v19 = vpop.f32.mrb[46].mxu1  ;;  %3985 = vpow2.f32 %v2392_v17  ;;  %vm2172_vm4 = vcmp.gt.f32.partialorder %v5287_v28, 0.0  ;;  %v2308_v57 = vmul.f32 1.442695, %v2237_v52  ;;  %vm2186_vm5 = vcmp.gt.f32.partialorder %v5303_v43, 0.0 }
 0x2c4   : > { %v5358_v44 = vpop.f32.mrb[47].mxu1  ;;  %3987 = vpow2.f32 %v2396_v18  ;;  %v2370_v2 = vmul.f32 1.442695, %v2268_v35  ;;  %v5373_v23 = vadd.f32 %v1805_v19, %v5217_v51  ;;  %v2282_v17 = vmin.f32 %v5363_v40, 0.0 }
 0x2c5   : > { %v3976_v6 = vpop.eup %3975  ;;  %3989 = vpow2.f32 %v2304_v29  ;;  %v2253_v22 = vmin.f32 %v5370_v59, 0.0  ;;  %v2336_v34 = vmul.f32 1.442695, %v2251_v55  ;;  %v5392_v49 = vadd.f32 %v5321_v39, %v5208_v50 }
 0x2c6   : > { %3991 = vpow2.f32 %v2366_v48  ;;  %v3532_v0 = vadd.f32 -1.0, %v3976_v6  ;;  %v2284_v18 = vmin.f32 %v5373_v23, 0.0  ;;  %v2398_v42 = vmul.f32 1.442695, %v2282_v17 }
 0x2c7   : > { %3993 = vpow2.f32 %v2370_v2  ;;  %v3686_v19 = vpack.c.bf16 %v2503_v58, %v2487_v61  ;;  %v2505_v6 = vsel %vm2185_vm2, %v5240_v8, %v3547_v7  ;;  %v5406_v61 = vadd.f32 %v5339_v5, %v5208_v50 }
 0x2c8   : > { %v3978_v4 = vpop.eup %3977  ;;  %v2402_v48 = vmul.f32 1.442695, %v2284_v18  ;;  %v5402_v39 = vsel %vm2170_vm3, %v5279_v36, %v3532_v0  ;;  %3995 = vpow2.f32 %v2398_v42  ;;  %v3694_v58 = vpack.c.bf16 %v2505_v6, %v2489_v33 }
 0x2c9   : > { %v3980_v45 = vpop.eup %3979  ;;  %v3534_v35 = vadd.f32 -1.0, %v3978_v4  ;;  %3687 = vmatprep.subr.bf16.mxu0 %v3686_v19  ;;  %vm2188_vm6 = vcmp.gt.f32.partialorder %v5307_v16, 0.0  ;;  %v2340_v33 = vmul.f32 1.442695, %v2253_v22  ;;  %v2267_v17 = vmin.f32 %v5392_v49, 0.0 }
 0x2ca   : > { %v3982_v3 = vpop.eup %3981  ;;  %v3548_v56 = vadd.f32 -1.0, %v3980_v45  ;;  %3997 = vpow2.f32 %v2402_v48  ;;  %3689 = vmatpush1.bf16.msra.mxu0 %v3688_v38  ;;  %3695 = vmatprep.subr.bf16.mxu1 %v3694_v58  ;;  %v5433_v38 = vadd.f32 %v5348_v37, %v5217_v51  ;;  %vm2202_vm10 = vcmp.gt.f32.partialorder %v5343_v47, 0.0 }
 0x2cb   : > { %v1876_v29 = vpop.f32.mrb[48].mxu0  ;;  %v1965_v14 = vpop.f32.mrb[48].mxu1  ;;  %v5426_v12 = vsel %vm2172_vm4, %v5287_v28, %v3534_v35  ;;  %3697 = vmatpush1.bf16.msra.mxu1 %v3696_v9  ;;  %v5445_v28 = vadd.f32 -1.0, %v3982_v3  ;;  %3999 = vpow2.f32 %v2308_v57  ;;  %v5460_v57 = vadd.f32 %v5358_v44, %v5217_v51 }
 0x2cc   : > { %v1878_v52 = vpop.f32.mrb[49].mxu0  ;;  %v5397_v2 = vpop.f32.mrb[49].mxu1  ;;  %v5411_v8 = vsel %vm2186_vm5, %v5303_v43, %v3548_v56  ;;  %v5417_v36 = vadd.f32 %v1876_v29, %v4895_v15  ;;  %v5451_v37 = vadd.f32 %v1965_v14, %v4895_v15  ;;  %v2269_v29 = vmin.f32 %v5406_v61, 0.0 }
 0x2cd   : > { %v3984_v55 = vpop.eup %3983  ;;  %4001 = vpow2.f32 %v2336_v34  ;;  %6057 = vst [vmem:[#allocation12_spill] sm:$0xff] %v5460_v57  ;;  %vm2217_vm12 = vcmp.gt.f32.partialorder %v5295_v63, 0.0  ;;  %vm2204_vm13 = vcmp.gt.f32.partialorder %v5346_v13, 0.0  ;;  %v2368_v6 = vmul.f32 1.442695, %v2267_v17 }
 0x2ce   : > { %v3986_v4 = vpop.eup %3985  ;;  %v3550_v7 = vadd.f32 -1.0, %v3984_v55  ;;  %v2238_v22 = vmin.f32 %v5417_v36, 0.0  ;;  %v2240_v14 = vmin.f32 %v5451_v37, 0.0  ;;  %4003 = vpow2.f32 %v2340_v33 }
 0x2cf   : > { %v3988_v5 = vpop.eup %3987  ;;  %v1882_v43 = vpop.f32.mrb[50].mxu0  ;;  %v3577_v26 = vadd.f32 -1.0, %v3986_v4  ;;  %v2283_v34 = vmin.f32 %v5433_v38, 0.0  ;;  %vm2218_vm14 = vcmp.gt.f32.partialorder %v5363_v40, 0.0  ;;  %vm2220_vm15 = vcmp.gt.f32.partialorder %v5373_v23, 0.0 }
 0x2d0   : > { %v1971_v18 = vpop.f32.mrb[50].mxu1  ;;  %v5429_v25 = vsel %vm2188_vm6, %v5307_v16, %v3550_v7  ;;  %v5439_v45 = vpop.f32.mrb[51].mxu0  ;;  %v5454_v9 = vadd.f32 -1.0, %v3988_v5  ;;  %v2310_v35 = vmul.f32 1.442695, %v2238_v22  ;;  %v5472_v7 = vadd.f32 %v1878_v52, %v4895_v15 }
 0x2d1   : > { %v5441_v42 = vpop.f32.mrb[51].mxu1  ;;  %v5443_v19 = vpop.eup %3989  ;;  %v2314_v4 = vmul.f32 1.442695, %v2240_v14  ;;  %v2372_v22 = vmul.f32 1.442695, %v2269_v29  ;;  %v5476_v33 = vadd.f32 %v1882_v43, %v4869_v62  ;;  %v2285_v16 = vmin.f32 %v5460_v57, 0.0 }
 0x2d2   : > { %v3992_v31 = vpop.eup %3991  ;;  %4005 = vpow2.f32 %v2310_v35  ;;  %v2400_v14 = vmul.f32 1.442695, %v2283_v34  ;;  %v2239_v24 = vmin.f32 %v5472_v7, 0.0  ;;  %v5500_v57 = vadd.f32 %v1971_v18, %v4869_v62 }
 0x2d3   : > { %v3994_v3 = vpop.eup %3993  ;;  %v1888_v56 = vpop.f32.mrb[52].mxu0  ;;  %v3564_v44 = vadd.f32 -1.0, %v3992_v31  ;;  %4007 = vpow2.f32 %v2314_v4  ;;  %v5482_v31 = vadd.f32 %v5397_v2, %v4895_v15  ;;  %v2254_v43 = vmin.f32 %v5476_v33, 0.0 }
 0x2d4   : > { %v1977_v48 = vpop.f32.mrb[52].mxu1  ;;  %v5467_v55 = vpop.f32.mrb[53].mxu0  ;;  %v3566_v5 = vadd.f32 -1.0, %v3994_v3  ;;  %4009 = vpow2.f32 %v2368_v6  ;;  %vm2171_vm0 = vcmp.gt.f32.partialorder %v5299_v32, 0.0  ;;  %vm2187_vm1 = vcmp.gt.f32.partialorder %v5355_v30, 0.0 }
 0x2d5   : > { %v5469_v58 = vpop.f32.mrb[53].mxu1  ;;  %v3996_v17 = vpop.eup %3995  ;;  %6058 = vst [vmem:[#allocation13_spill] sm:$0xff] %v5482_v31  ;;  %v5496_v4 = vsel %vm2202_vm10, %v5343_v47, %v3564_v44  ;;  %v2535_v47 = vsel %vm2215_vm8, %v5283_v11, %v3577_v26  ;;  %v2256_v26 = vmin.f32 %v5500_v57, 0.0  ;;  %vm2174_vm2 = vcmp.gt.f32.partialorder %v5417_v36, 0.0 }
 0x2d6   : > { %v3998_v29 = vpop.eup %3997  ;;  %v3580_v3 = vadd.f32 -1.0, %v3996_v17  ;;  %v5505_v6 = vsel %vm2204_vm13, %v5346_v13, %v3566_v5  ;;  %v2342_v17 = vmul.f32 1.442695, %v2254_v43  ;;  %v2241_v13 = vmin.f32 %v5482_v31, 0.0 }
 0x2d7   : > { %v5484_v35 = vpop.f32.mrb[54].mxu0  ;;  %v3582_v2 = vadd.f32 -1.0, %v3998_v29  ;;  %6059 = vst [vmem:[#allocation14_spill] sm:$0xff] %v5505_v6  ;;  %v4000_v44 = vpop.eup %3999  ;;  %v2404_v31 = vmul.f32 1.442695, %v2285_v16  ;;  %v5551_v16 = vadd.f32 %v5439_v45, %v4869_v62  ;;  %v5554_v6 = vadd.f32 %v1977_v48, %v5208_v50 }
 0x2d8   : > { %v5486_v52 = vpop.f32.mrb[54].mxu1  ;;  %v5489_v0 = vpop.f32.mrb[55].mxu0  ;;  %v5510_v34 = vsel %vm2218_vm14, %v5363_v40, %v3580_v3  ;;  %v2519_v40 = vsel %vm2199_vm9, %v5248_v41, %v5379_v10  ;;  %4011 = vpow2.f32 %v2342_v17  ;;  %v2521_v41 = vsel %vm2201_vm11, %v5255_v20, %v5445_v28 }
 0x2d9   : > { %v5491_v46 = vpop.f32.mrb[55].mxu1  ;;  %v5520_v29 = vsel %vm2220_vm15, %v5373_v23, %v3582_v2  ;;  %v3690_v43 = vpack.c.bf16 %v2535_v47, %v2519_v40  ;;  %v4002_v18 = vpop.eup %4001  ;;  %v2537_v10 = vsel %vm2217_vm12, %v5295_v63, %v5454_v9  ;;  %v5547_v17 = vadd.f32 %v1888_v56, %v5208_v50 }
 0x2da   : > { %6060 = vst [vmem:[#allocation15_spill] sm:$0xff] %v5520_v29  ;;  %v4004_v47 = vpop.eup %4003  ;;  %v2346_v40 = vmul.f32 1.442695, %v2256_v26  ;;  %v3698_v11 = vpack.c.bf16 %v2537_v10, %v2521_v41  ;;  %v5556_v20 = vpop.trf.xlu1  ;;  %v5559_v29 = vadd.f32 -1.0, %v5443_v19  ;;  %4013 = vpow2.f32 %v2372_v22 }
 0x2db   : > { %v5527_v5 = vpop.f32.mrb[56].mxu0  ;;  %3691 = vmatprep.subr.bf16.mxu0 %v3690_v43  ;;  %v2312_v63 = vmul.f32 1.442695, %v2239_v24  ;;  %v5563_v9 = vadd.f32 %v5441_v42, %v4869_v62  ;;  %v6061_v56 = vpack.c.bf16 %v5317_v21, %v5312_v60  ;;  %v5573_v26 = vadd.f32 -1.0, %v4000_v44 }
 0x2dc   : > { %v5529_v3 = vpop.f32.mrb[56].mxu1  ;;  %v5534_v23 = vpop.f32.mrb[57].mxu0  ;;  %v2316_v24 = vmul.f32 1.442695, %v2241_v13  ;;  %4015 = vpow2.f32 %v2346_v40  ;;  %3699 = vmatprep.subr.bf16.mxu1 %v3698_v11  ;;  %v3549_v21 = vadd.f32 -1.0, %v4002_v18  ;;  %v6062_v22 = vpack.c.bf16 %v5333_v53, %v5326_v54 }
 0x2dd   : > { %v5536_v2 = vpop.f32.mrb[57].mxu1  ;;  %v4006_v28 = vpop.eup %4005  ;;  %3693 = vmatpush1.bf16.msra.mxu0 %v6061_v56  ;;  %4017 = vpow2.f32 %v2400_v14  ;;  %v2270_v44 = vmin.f32 %v5547_v17, 0.0  ;;  %v2272_v43 = vmin.f32 %v5554_v6, 0.0  ;;  %vm2173_vm3 = vcmp.gt.f32.partialorder %v5352_v27, 0.0 }
 0x2de   : > { %v4008_v60 = vpop.eup %4007  ;;  %3701 = vmatpush1.bf16.msra.mxu1 %v6062_v22  ;;  %vm2189_vm4 = vcmp.gt.f32.partialorder %v5370_v59, 0.0  ;;  %4019 = vpow2.f32 %v2404_v31  ;;  %v3536_v13 = vadd.f32 -1.0, %v4006_v28  ;;  %v2255_v11 = vmin.f32 %v5551_v16, 0.0 }
 0x2df   : > { %v5568_v45 = vpop.f32.mrb[58].mxu0  ;;  %v5586_v41 = vpop.eup %4009  ;;  %v5593_v14 = vadd.f32 %v5467_v55, %v5208_v50  ;;  %4021 = vpow2.f32 %v2312_v63  ;;  %v2257_v54 = vmin.f32 %v5563_v9, 0.0  ;;  %v2374_v53 = vmul.f32 1.442695, %v2270_v44 }
 0x2e0   : > { %v5570_v48 = vpop.f32.mrb[58].mxu1  ;;  %v5577_v42 = vpop.f32.mrb[59].mxu0  ;;  %3592 = vmatmul.mubr.msk.f32.vlgmr.msra.gmra.mrb[64].mxu0 %vm1445_vm7, %v5556_v20  ;;  %v2378_v18 = vmul.f32 1.442695, %v2272_v43  ;;  %v3551_v31 = vadd.f32 -1.0, %v4004_v47  ;;  %v3538_v40 = vadd.f32 -1.0, %v4008_v60  ;;  %4023 = vpow2.f32 %v2316_v24 }
 0x2e1   : > { %v5579_v19 = vpop.f32.mrb[59].mxu1  ;;  %6063 = vst [vmem:[#allocation16_spill] sm:$0xff] %v5593_v14  ;;  %2803 = vmatprep.mubr.f32.mxu0 %v6048_v1  ;;  %v2271_v28 = vmin.f32 %v5593_v14, 0.0  ;;  %3593 = vmatmul.mubr.msk.f32.vlgmr.msra.gmra.mrb[64].mxu1 %vm1445_vm7, %v5556_v20  ;;  %4025 = vpow2.f32 %v2374_v53  ;;  %v5610_v63 = vadd.f32 %v5469_v58, %v5208_v50  ;;  %v5614_v22 = vadd.f32 %v5484_v35, %v5217_v51 }
 0x2e2   : > { %v5618_v47 = vadd.f32 %v5486_v52, %v5217_v51  ;;  %2874 = vmatprep.mubr.f32.mxu1 %v6048_v1  ;;  %v4012_v60 = vpop.eup %4011  ;;  %vm2176_vm5 = vcmp.gt.f32.partialorder %v5451_v37, 0.0  ;;  %vm2190_vm6 = vcmp.gt.f32.partialorder %v5476_v33, 0.0  ;;  %v2344_v44 = vmul.f32 1.442695, %v2255_v11 }
 0x2e3   : > { %v5598_v10 = vpop.f32.mrb[60].mxu0  ;;  %6065 = vst [vmem:[#allocation18_spill] sm:$0xff] %v5610_v63  ;;  %4027 = vpow2.f32 %v2378_v18  ;;  %v5628_v58 = vsel %vm2174_vm2, %v5417_v36, %v3536_v13  ;;  %v3552_v35 = vadd.f32 -1.0, %v4012_v60  ;;  %vm2192_vm8 = vcmp.gt.f32.partialorder %v5500_v57, 0.0 }
 0x2e4   : > { %v5604_v55 = vpop.f32.mrb[60].mxu1  ;;  %v5606_v56 = vpop.f32.mrb[61].mxu0  ;;  %v2348_v52 = vmul.f32 1.442695, %v2257_v54  ;;  %v5636_v14 = vsel %vm2176_vm5, %v5451_v37, %v3538_v40  ;;  %v2286_v11 = vmin.f32 %v5614_v22, 0.0  ;;  %v2288_v18 = vmin.f32 %v5618_v47, 0.0 }
 0x2e5   : > { %6064 = vst [vmem:[#allocation17_spill] sm:$0xff] %v5606_v56  ;;  %v5620_v24 = vpop.f32.mrb[61].mxu1  ;;  %v4014_v13 = vpop.eup %4013  ;;  %v5647_v54 = vsel %vm2190_vm6, %v5476_v33, %v3552_v35  ;;  %v2273_v60 = vmin.f32 %v5610_v63, 0.0  ;;  %v2491_v37 = vsel %vm2171_vm0, %v5299_v32, %v5559_v29  ;;  %v2507_v40 = vsel %vm2187_vm1, %v5355_v30, %v3549_v21 }
 0x2e6   : > { %6066 = vst [vmem:[#allocation19_spill] sm:$0xff] %v5620_v24  ;;  %v2376_v24 = vmul.f32 1.442695, %v2271_v28  ;;  %v4016_v28 = vpop.eup %4015  ;;  %v2493_v63 = vsel %vm2173_vm3, %v5352_v27, %v5573_v26  ;;  %v2509_v32 = vsel %vm2189_vm4, %v5370_v59, %v3551_v31  ;;  %v5668_v30 = vadd.f32 %v5489_v0, %v5217_v51 }
 0x2e7   : > { %v5631_v43 = vpop.f32.mrb[62].mxu0  ;;  %v4018_v33 = vpop.eup %4017  ;;  %v3554_v35 = vadd.f32 -1.0, %v4016_v28  ;;  %vm2219_vm9 = vcmp.gt.f32.partialorder %v5433_v38, 0.0  ;;  %v3710_v21 = vpack.c.bf16 %v2509_v32, %v2493_v63  ;;  %v5677_v27 = vadd.f32 %v5527_v5, %v4895_v15 }
 0x2e8   : > { %6067 = vst [vmem:[#allocation20_spill] sm:$0xff] %v5631_v43  ;;  %v5633_v53 = vpop.f32.mrb[62].mxu1  ;;  %v5640_v56 = vpop.f32.mrb[63].mxu0  ;;  %v3702_v43 = vpack.c.bf16 %v2507_v40, %v2491_v37  ;;  %v2380_v0 = vmul.f32 1.442695, %v2273_v60  ;;  %v2287_v31 = vmin.f32 %v5668_v30, 0.0 }
 0x2e9   : > { %6068 = vst [vmem:[#allocation21_spill] sm:$0xff] %v5633_v53  ;;  %6069 = vst [vmem:[#allocation22_spill] sm:$0xff] %v5640_v56  ;;  %v5642_v36 = vpop.f32.mrb[63].mxu1  ;;  %v2406_v56 = vmul.f32 1.442695, %v2286_v11  ;;  %v4020_v29 = vpop.eup %4019  ;;  %v5673_v11 = vadd.f32 %v5491_v46, %v5217_v51  ;;  %v5684_v59 = vsel %vm2192_vm8, %v5500_v57, %v3554_v35  ;;  %vm2203_vm10 = vcmp.gt.f32.partialorder %v5392_v49, 0.0  ;;  %3711 = vmatprep.subr.bf16.mxu1 %v3710_v21 }
 0x2ea   : > { %6070 = vst [vmem:[#allocation23_spill] sm:$0xff] %v5642_v36  ;;  %v3720_v36 = vpack.c.bf16 %v5647_v54, %v5628_v58  ;;  %v2410_v53 = vmul.f32 1.442695, %v2288_v18  ;;  %3703 = vmatprep.subr.bf16.mxu0 %v3702_v43  ;;  %v5679_v26 = vpop.eup %4021  ;;  %v3565_v5 = vadd.f32 -1.0, %v5586_v41  ;;  %v3728_v63 = vpack.c.bf16 %v5684_v59, %v5636_v14  ;;  %v6073_v37 = vld [vmem:[#allocation12_spill] sm:$0xff] }
 0x2eb   : > { %4029 = vpow2.f32 %v2406_v56  ;;  %v6071_v56 = vpack.c.bf16 %v5411_v8, %v5402_v39  ;;  %v5690_v46 = vpop.eup %4023  ;;  %v2289_v57 = vmin.f32 %v5673_v11, 0.0  ;;  %v2408_v18 = vmul.f32 1.442695, %v2287_v31 }
 0x2ec   : > { %4031 = vpow2.f32 %v2410_v53  ;;  %v4026_v43 = vpop.eup %4025  ;;  %v3567_v53 = vadd.f32 -1.0, %v4014_v13  ;;  %v6072_v39 = vpack.c.bf16 %v5429_v25, %v5426_v12  ;;  %v2242_v8 = vmin.f32 %v5677_v27, 0.0 }
 0x2ed   : > { %3705 = vmatpush1.bf16.msra.mxu0 %v6071_v56  ;;  %4033 = vpow2.f32 %v2344_v44  ;;  %v4028_v60 = vpop.eup %4027  ;;  %vm2205_vm11 = vcmp.gt.f32.partialorder %v5406_v61, 0.0  ;;  %v2412_v41 = vmul.f32 1.442695, %v2289_v57  ;;  %v5704_v44 = vadd.f32 %v5529_v3, %v4895_v15 }
 0x2ee   : > { %4035 = vpow2.f32 %v2348_v52  ;;  %3713 = vmatpush1.bf16.msra.mxu1 %v6072_v39  ;;  %v5708_v13 = vadd.f32 %v5534_v23, %v4895_v15  ;;  %v3581_v52 = vadd.f32 -1.0, %v4018_v33  ;;  %vm2221_vm12 = vcmp.gt.f32.partialorder %v6073_v37, 0.0 }
 0x2ef   : > { %4037 = vpow2.f32 %v2376_v24  ;;  %v2318_v12 = vmul.f32 1.442695, %v2242_v8  ;;  %v5713_v25 = vadd.f32 %v5536_v2, %v4895_v15  ;;  %v3583_v40 = vadd.f32 -1.0, %v4020_v29 }
 0x2f0   : > { %4039 = vpow2.f32 %v2380_v0  ;;  %v3568_v24 = vadd.f32 -1.0, %v4026_v43  ;;  %v2244_v28 = vmin.f32 %v5704_v44, 0.0  ;;  %vm2206_vm13 = vcmp.gt.f32.partialorder %v5547_v17, 0.0 }
 0x2f1   : > { %4041 = vpow2.f32 %v2408_v18  ;;  %vm2208_vm14 = vcmp.gt.f32.partialorder %v5554_v6, 0.0  ;;  %v3570_v3 = vadd.f32 -1.0, %v4028_v60  ;;  %vm2222_vm15 = vcmp.gt.f32.partialorder %v5614_v22, 0.0 }
 0x2f2   : > { %4043 = vpow2.f32 %v2318_v12  ;;  %v2322_v23 = vmul.f32 1.442695, %v2244_v28  ;;  %v2243_v33 = vmin.f32 %v5708_v13, 0.0  ;;  %v2245_v15 = vmin.f32 %v5713_v25, 0.0 }
 0x2f3   : > { %4045 = vpow2.f32 %v2412_v41  ;;  %v5723_v2 = vadd.f32 %v5568_v45, %v4869_v62  ;;  %v5727_v35 = vadd.f32 %v5570_v48, %v4869_v62  ;;  %v2539_v32 = vsel %vm2219_vm9, %v5433_v38, %v3581_v52 }
 0x2f4   : > { %v5733_v21 = vsel %vm2206_vm13, %v5547_v17, %v3568_v24  ;;  %vm2224_vm0 = vcmp.gt.f32.partialorder %v5618_v47, 0.0  ;;  %4047 = vpow2.f32 %v2322_v23  ;;  %v2320_v0 = vmul.f32 1.442695, %v2243_v33 }
 0x2f5   : > { %v4030_v29 = vpop.eup %4029  ;;  %v5739_v45 = vsel %vm2208_vm14, %v5554_v6, %v3570_v3  ;;  %v2258_v56 = vmin.f32 %v5723_v2, 0.0  ;;  %v2523_v38 = vsel %vm2203_vm10, %v5392_v49, %v3565_v5  ;;  %v2260_v43 = vmin.f32 %v5727_v35, 0.0 }
 0x2f6   : > { %v4032_v31 = vpop.eup %4031  ;;  %v3584_v48 = vadd.f32 -1.0, %v4030_v29  ;;  %4049 = vpow2.f32 %v2320_v0  ;;  %v3706_v18 = vpack.c.bf16 %v2539_v32, %v2523_v38  ;;  %v2324_v6 = vmul.f32 1.442695, %v2245_v15 }
 0x2f7   : > { %v4034_v57 = vpop.eup %4033  ;;  %v3586_v17 = vadd.f32 -1.0, %v4032_v31  ;;  %v2350_v60 = vmul.f32 1.442695, %v2258_v56  ;;  %v2525_v41 = vsel %vm2205_vm11, %v5406_v61, %v3567_v53  ;;  %v2354_v12 = vmul.f32 1.442695, %v2260_v43  ;;  %v6080_v43 = vld [vmem:[#allocation19_spill] sm:$0xff] }
 0x2f8   : > { %v4036_v39 = vpop.eup %4035  ;;  %v5749_v8 = vsel %vm2222_vm15, %v5614_v22, %v3584_v48  ;;  %3707 = vmatprep.subr.bf16.mxu0 %v3706_v18  ;;  %v2541_v22 = vsel %vm2221_vm12, %v6073_v37, %v3583_v40  ;;  %v5768_v53 = vadd.f32 %v5577_v42, %v4869_v62  ;;  %v5774_v23 = vadd.f32 -1.0, %v5679_v26 }
 0x2f9   : > { %v4038_v52 = vpop.eup %4037  ;;  %v3724_v49 = vpack.c.bf16 %v5749_v8, %v5733_v21  ;;  %v5759_v5 = vsel %vm2224_vm0, %v5618_v47, %v3586_v17  ;;  %4051 = vpow2.f32 %v2350_v60  ;;  %v3714_v61 = vpack.c.bf16 %v2541_v22, %v2525_v41 }
 0x2fa   : > { %v4040_v24 = vpop.eup %4039  ;;  %v3732_v28 = vpack.c.bf16 %v5759_v5, %v5739_v45  ;;  %v6074_v47 = vpack.c.bf16 %v5510_v34, %v5496_v4  ;;  %vm2191_vm1 = vcmp.gt.f32.partialorder %v5551_v16, 0.0  ;;  %4053 = vpow2.f32 %v2354_v12  ;;  %v6081_v12 = vld [vmem:[#allocation16_spill] sm:$0xff] }
 0x2fb   : > { %v4042_v3 = vpop.eup %4041  ;;  %v5779_v37 = vadd.f32 %v5579_v19, %v4869_v62  ;;  %v5783_v40 = vadd.f32 %v5598_v10, %v5208_v50  ;;  %v5786_v33 = vadd.f32 -1.0, %v5690_v46  ;;  %v3553_v4 = vadd.f32 -1.0, %v4034_v57  ;;  %3715 = vmatprep.subr.bf16.mxu1 %v3714_v61  ;;  %v6075_v10 = vld [vmem:[#allocation15_spill] sm:$0xff]  ;;  %v6076_v46 = vld [vmem:[#allocation14_spill] sm:$0xff]  ;;  %v6079_v57 = vld [vmem:[#allocation17_spill] sm:$0xff] }
 0x2fc   : > { %3709 = vmatpush1.bf16.msra.mxu0 %v6074_v47  ;;  %v4044_v42 = vpop.eup %4043  ;;  %v2259_v34 = vmin.f32 %v5768_v53, 0.0  ;;  %v5791_v26 = vadd.f32 %v5604_v55, %v5208_v50  ;;  %vm2175_vm2 = vcmp.gt.f32.partialorder %v5472_v7, 0.0  ;;  %v5794_v62 = vadd.f32 -1.0, %v4036_v39  ;;  %v6078_v55 = vld [vmem:[#allocation13_spill] sm:$0xff] }
 0x2fd   : > { %v4046_v15 = vpop.eup %4045  ;;  %vm2178_vm3 = vcmp.gt.f32.partialorder %v5677_v27, 0.0  ;;  %vm2180_vm4 = vcmp.gt.f32.partialorder %v5704_v44, 0.0  ;;  %v2261_v19 = vmin.f32 %v5779_v37, 0.0  ;;  %v6077_v32 = vpack.c.bf16 %v6075_v10, %v6076_v46  ;;  %v6083_v46 = vld [vmem:[#allocation18_spill] sm:$0xff] }
 0x2fe   : > { %vm2177_vm5 = vcmp.gt.f32.partialorder %v6078_v55, 0.0  ;;  %4055 = vpow2.f32 %v2324_v6  ;;  %v2352_v29 = vmul.f32 1.442695, %v2259_v34  ;;  %v2274_v0 = vmin.f32 %v5783_v40, 0.0  ;;  %v4048_v48 = vpop.eup %4047 }
 0x2ff   : > { %3717 = vmatpush1.bf16.msra.mxu1 %v6077_v32  ;;  %3594 = vmatmul.mubr.msk.f32.vlgmr.msra.gmra.mrb[66].mxu0 %vm1445_vm7, %v5556_v20  ;;  %v2276_v31 = vmin.f32 %v5791_v26, 0.0  ;;  %vm2193_vm6 = vcmp.gt.f32.partialorder %v5563_v9, 0.0  ;;  %v3540_v56 = vadd.f32 -1.0, %v4044_v42  ;;  %v2356_v38 = vmul.f32 1.442695, %v2261_v19  ;;  %v6082_v19 = vld [vmem:[#allocation20_spill] sm:$0xff] }
 0x300   : > { %2945 = vmatprep.mubr.f32.mxu0 %v6048_v1  ;;  %v5811_v17 = vadd.f32 %v6079_v57, %v5208_v50  ;;  %v5815_v18 = vadd.f32 %v6080_v43, %v5208_v50  ;;  %v3569_v39 = vadd.f32 -1.0, %v4038_v52  ;;  %v3542_v6 = vadd.f32 -1.0, %v4048_v48  ;;  %v4050_v41 = vpop.eup %4049  ;;  %v6084_v32 = vld [vmem:[#allocation21_spill] sm:$0xff] }
 0x301   : > { %4057 = vpow2.f32 %v2352_v29  ;;  %v2382_v60 = vmul.f32 1.442695, %v2274_v0  ;;  %vm2207_vm8 = vcmp.gt.f32.partialorder %v6081_v12, 0.0  ;;  %v5820_v22 = vadd.f32 -1.0, %v4040_v24 }
 0x302   : > { %3595 = vmatmul.mubr.msk.f32.vlgmr.msra.gmra.mrb[66].mxu1 %vm1445_vm7, %v5556_v20  ;;  %vm2223_vm9 = vcmp.gt.f32.partialorder %v5668_v30, 0.0  ;;  %4059 = vpow2.f32 %v2356_v38  ;;  %v2386_v61 = vmul.f32 1.442695, %v2276_v31  ;;  %v2275_v47 = vmin.f32 %v5811_v17, 0.0 }
 0x303   : > { %3016 = vmatprep.mubr.f32.mxu1 %v6048_v1  ;;  %v3585_v50 = vadd.f32 -1.0, %v4042_v3  ;;  %vm2194_vm10 = vcmp.gt.f32.partialorder %v5723_v2, 0.0  ;;  %vm2196_vm11 = vcmp.gt.f32.partialorder %v5727_v35, 0.0  ;;  %v2277_v52 = vmin.f32 %v5815_v18, 0.0  ;;  %v4052_v10 = vpop.eup %4051 }
 0x304   : > { %v3587_v42 = vadd.f32 -1.0, %v4046_v15  ;;  %v5831_v24 = vsel %vm2178_vm3, %v5677_v27, %v3540_v56  ;;  %v5836_v34 = vsel %vm2180_vm4, %v5704_v44, %v3542_v6  ;;  %v5840_v3 = vadd.f32 %v6082_v19, %v5217_v51  ;;  %v4054_v29 = vpop.eup %4053  ;;  %v6086_v19 = vld [vmem:[#allocation23_spill] sm:$0xff] }
 0x305   : > { %vm2209_vm12 = vcmp.gt.f32.partialorder %v6083_v46, 0.0  ;;  %vm2225_vm13 = vcmp.gt.f32.partialorder %v5673_v11, 0.0  ;;  %v3541_v15 = vadd.f32 -1.0, %v4050_v41  ;;  %4061 = vpow2.f32 %v2382_v60 }
 0x306   : > { %v5846_v27 = vadd.f32 %v6084_v32, %v5217_v51  ;;  %v2511_v44 = vsel %vm2191_vm1, %v5551_v16, %v3553_v4  ;;  %vm2179_vm14 = vcmp.gt.f32.partialorder %v5708_v13, 0.0  ;;  %v3556_v0 = vadd.f32 -1.0, %v4052_v10 }
 0x307   : > { %4063 = vpow2.f32 %v2386_v61  ;;  %v2384_v31 = vmul.f32 1.442695, %v2275_v47  ;;  %v2290_v48 = vmin.f32 %v5840_v3, 0.0  ;;  %v3558_v56 = vadd.f32 -1.0, %v4054_v29 }
 0x308   : > { %v2388_v38 = vmul.f32 1.442695, %v2277_v52  ;;  %v2292_v57 = vmin.f32 %v5846_v27, 0.0  ;;  %v2495_v43 = vsel %vm2175_vm2, %v5472_v7, %v5774_v23  ;;  %v2514_v16 = vsel %vm2194_vm10, %v5723_v2, %v3556_v0  ;;  %v4056_v41 = vpop.eup %4055 }
 0x309   : > { %v2414_v4 = vmul.f32 1.442695, %v2290_v48  ;;  %v3718_v6 = vpack.c.bf16 %v2511_v44, %v2495_v43  ;;  %v2497_v60 = vsel %vm2177_vm5, %v6078_v55, %v5786_v33  ;;  %v3736_v61 = vpack.c.bf16 %v2514_v16, %v5831_v24  ;;  %v6085_v33 = vld [vmem:[#allocation22_spill] sm:$0xff] }
 0x30a   : > { %v2516_v47 = vsel %vm2196_vm11, %v5727_v35, %v3558_v56  ;;  %v2418_v52 = vmul.f32 1.442695, %v2292_v57  ;;  %v2513_v7 = vsel %vm2193_vm6, %v5563_v9, %v5794_v62  ;;  %v5876_v55 = vadd.f32 %v6085_v33, %v5217_v51 }
 0x30b   : > { %v3744_v2 = vpack.c.bf16 %v2516_v47, %v5836_v34  ;;  %4065 = vpow2.f32 %v2414_v4  ;;  %3719 = vmatprep.subr.bf16.mxu0 %v3718_v6  ;;  %v3726_v23 = vpack.c.bf16 %v2513_v7, %v2497_v60  ;;  %v4058_v24 = vpop.eup %4057  ;;  %v5880_v35 = vadd.f32 %v6086_v19, %v5217_v51 }
 0x30c   : > { %4067 = vpow2.f32 %v2418_v52  ;;  %3721 = vmatpush1.bf16.msra.mxu0 %v3720_v36  ;;  %v2527_v9 = vsel %vm2207_vm8, %v6081_v12, %v3569_v39  ;;  %v2543_v62 = vsel %vm2223_vm9, %v5668_v30, %v3585_v50  ;;  %v4060_v34 = vpop.eup %4059  ;;  %v3557_v10 = vadd.f32 -1.0, %v4058_v24 }
 0x30d   : > { %4069 = vpow2.f32 %v2384_v31  ;;  %3727 = vmatprep.subr.bf16.mxu1 %v3726_v23  ;;  %v2291_v32 = vmin.f32 %v5876_v55, 0.0  ;;  %v3722_v51 = vpack.c.bf16 %v2543_v62, %v2527_v9  ;;  %v3543_v44 = vadd.f32 -1.0, %v4056_v41 }
 0x30e   : > { %v3559_v29 = vadd.f32 -1.0, %v4060_v34  ;;  %4071 = vpow2.f32 %v2388_v38  ;;  %v2293_v58 = vmin.f32 %v5880_v35, 0.0  ;;  %3729 = vmatpush1.bf16.msra.mxu1 %v3728_v63  ;;  %vm2195_vm15 = vcmp.gt.f32.partialorder %v5768_v53, 0.0 }
 0x30f   : > { %v2416_v36 = vmul.f32 1.442695, %v2291_v32  ;;  %3723 = vmatprep.subr.bf16.mxu0 %v3722_v51  ;;  %v2529_v54 = vsel %vm2209_vm12, %v6083_v46, %v5820_v22  ;;  %v2545_v30 = vsel %vm2225_vm13, %v5673_v11, %v3587_v42  ;;  %v4062_v39 = vpop.eup %4061  ;;  %v2499_v14 = vsel %vm2179_vm14, %v5708_v13, %v3541_v15 }
 0x310   : > { %v2420_v12 = vmul.f32 1.442695, %v2293_v58  ;;  %v3730_v50 = vpack.c.bf16 %v2545_v30, %v2529_v54  ;;  %3725 = vmatpush1.bf16.msra.mxu0 %v3724_v49  ;;  %v2515_v59 = vsel %vm2195_vm15, %v5768_v53, %v3557_v10  ;;  %vm2181_vm0 = vcmp.gt.f32.partialorder %v5713_v25, 0.0 }
 0x311   : > { %v4064_v63 = vpop.eup %4063  ;;  %vm2197_vm1 = vcmp.gt.f32.partialorder %v5779_v37, 0.0  ;;  %4073 = vpow2.f32 %v2416_v36  ;;  %v3734_v11 = vpack.c.bf16 %v2515_v59, %v2499_v14  ;;  %v2501_v22 = vsel %vm2181_vm0, %v5713_v25, %v3543_v44 }
 0x312   : > { %4075 = vpow2.f32 %v2420_v12  ;;  %3731 = vmatprep.subr.bf16.mxu1 %v3730_v50  ;;  %v2517_v21 = vsel %vm2197_vm1, %v5779_v37, %v3559_v29  ;;  %v3572_v8 = vadd.f32 -1.0, %v4062_v39  ;;  %v3574_v53 = vadd.f32 -1.0, %v4064_v63 }
 0x313   : > { %3733 = vmatpush1.bf16.msra.mxu1 %v3732_v28  ;;  %3596 = vmatmul.mubr.msk.f32.vlgmr.msra.gmra.mrb[68].mxu0 %vm1445_vm7, %v5556_v20  ;;  %v3742_v13 = vpack.c.bf16 %v2517_v21, %v2501_v22  ;;  %vm2210_vm2 = vcmp.gt.f32.partialorder %v5783_v40, 0.0  ;;  %vm2226_vm3 = vcmp.gt.f32.partialorder %v5840_v3, 0.0  ;;  %vm2212_vm4 = vcmp.gt.f32.partialorder %v5791_v26, 0.0 }
 0x314   : > { %3735 = vmatprep.subr.bf16.mxu0 %v3734_v11  ;;  %3087 = vmatprep.mubr.f32.mxu0 %v6048_v1  ;;  %v2530_v28 = vsel %vm2210_vm2, %v5783_v40, %v3572_v8  ;;  %vm2228_vm5 = vcmp.gt.f32.partialorder %v5846_v27, 0.0  ;;  %v2532_v15 = vsel %vm2212_vm4, %v5791_v26, %v3574_v53  ;;  %vm2211_vm6 = vcmp.gt.f32.partialorder %v5811_v17, 0.0 }
 0x315   : > { %v4066_v49 = vpop.eup %4065  ;;  %3743 = vmatprep.subr.bf16.mxu1 %v3742_v13  ;;  %3737 = vmatpush1.bf16.msra.mxu0 %v3736_v61  ;;  %vm2227_vm8 = vcmp.gt.f32.partialorder %v5876_v55, 0.0  ;;  %vm2213_vm9 = vcmp.gt.f32.partialorder %v5815_v18, 0.0  ;;  %vm2229_vm10 = vcmp.gt.f32.partialorder %v5880_v35, 0.0  ;;  %v3200_v61 = vstv %s3601_s5  ;;  %s186_s5 = sand.u32 1, %s4186_s13  }
 0x316   : > { %v4068_v42 = vpop.eup %4067  ;;  %v3588_v25 = vadd.f32 -1.0, %v4066_v49  ;;  %3597 = vmatmul.mubr.msk.f32.vlgmr.msra.gmra.mrb[68].mxu1 %vm1445_vm7, %v5556_v20  ;;  %v3211_v9 = vstv %s3604_s8  ;;  %v3215_v30 = vstv %s3605_s9  ;;  %v3219_v50 = vstv %s3606_s10  ;;  %s3619_s9 = sshll.u32 %s4247_s16, 4  ;;  %s187_s10 = scalar_lea.vmem [#allocation7], %s186_s5 }
 0x317   : > { %v4070_v37 = vpop.eup %4069  ;;  %v3590_v45 = vadd.f32 -1.0, %v4068_v42  ;;  %3745 = vmatpush1.bf16.msra.mxu1 %v3744_v2  ;;  %3158 = vmatprep.mubr.f32.mxu1 %v6048_v1  ;;  %v3203_v2 = vstv %s3602_s6  ;;  %v3223_v21 = vstv %s3607_s11  ;;  %v3227_v53 = vstv %s3608_s17  ;;  %s4204_s6 = smov 0.0   ;;  %s3285_s11 = sshll.u32 %s187_s10, 4  ;;  %s5970_s11 = int_to_ptr.vmem [resolvable:$true] %s3285_s11 }
 0x318   : > { %v4072_v5 = vpop.eup %4071  ;;  %v2546_v46 = vsel %vm2226_vm3, %v5840_v3, %v3588_v25  ;;  %v3573_v48 = vadd.f32 -1.0, %v4070_v37  ;;  %s4205_s16 = smov [#allocation7]  }
 0x319   : > { %v3740_v0 = vpack.c.bf16 %v2546_v46, %v2530_v28  ;;  %v2548_v31 = vsel %vm2228_vm5, %v5846_v27, %v3590_v45  ;;  %v3575_v57 = vadd.f32 -1.0, %v4072_v5 }
 0x31a   : > { %v3748_v56 = vpack.c.bf16 %v2548_v31, %v2532_v15  ;;  %v2531_v26 = vsel %vm2211_vm6, %v5811_v17, %v3573_v48  ;;  %v5944_v17 = vstv %s3600_s4  ;;  %v3231_v48 = vstv %s3609_s19  ;;  %s3618_s4 = sld [smem:[#allocation6 + $0x22]] }
 0x31b   : > { %v4074_v38 = vpop.eup %4073  ;;  %v2533_v16 = vsel %vm2213_vm9, %v5815_v18, %v3575_v57 }
 0x31c   : > { %v4076_v43 = vpop.eup %4075  ;;  %v3589_v1 = vadd.f32 -1.0, %v4074_v38 }
 0x31d   : > { %v3591_v40 = vadd.f32 -1.0, %v4076_v43  ;;  %v3235_v43 = vstv %s3610_s20  ;;  %s5968_s20 = scalar_lea.hbm %s6013_s3, %s3619_s9 }
 0x31e   : > { %v2547_v3 = vsel %vm2227_vm8, %v5876_v55, %v3589_v1  ;;  %v3207_v55 = vstv %s3603_s7  ;;  %s3263_s7 = smax.f32 %s4204_s6, %s3617_s30 }
 0x31f   : > { %v3738_v27 = vpack.c.bf16 %v2547_v3, %v2531_v26  ;;  %v2549_v4 = vsel %vm2229_vm10, %v5880_v35, %v3591_v40 }
 0x320   : > { %v3746_v6 = vpack.c.bf16 %v2549_v4, %v2533_v16  ;;  %v3239_v4 = vstv %s3611_s25  ;;  %s3265_s8 = smax.f32 %s4204_s6, %s3618_s4  ;;  %s3273_s25 = scalar_lea.sflag [#allocation4], %s186_s5 }
 0x321   : > { %3739 = vmatprep.subr.bf16.mxu0 %v3738_v27 }
 0x322   : > { %3747 = vmatprep.subr.bf16.mxu1 %v3746_v6  ;;  %3741 = vmatpush1.bf16.msra.mxu0 %v3740_v0 }
 0x323   : > { %3749 = vmatpush1.bf16.msra.mxu1 %v3748_v56 }
 0x325   : > { %3598 = vmatmul.mubr.msk.f32.vlgmr.msra.gmra.mrb[70].mxu0 %vm1445_vm7, %v5556_v20 }
 0x326   : > { %3599 = vmatmul.mubr.msk.f32.vlgmr.msra.gmra.mrb[70].mxu1 %vm1445_vm7, %v5556_v20 }
 0x3b3   : > { %v2663_v18 = vpop.f32.mrb[64].mxu0 }
 0x3b4   : > { %v3167_v60 = vadd.f32 %v5944_v17, %v2663_v18  ;;  %v2665_v41 = vpop.f32.mrb[65].mxu0  ;;  %v2734_v52 = vpop.f32.mrb[64].mxu1 }
 0x3b5   : > { %v3168_v47 = vadd.f32 %v5944_v17, %v2665_v41  ;;  %v3169_v23 = vadd.f32 %v5944_v17, %v2734_v52  ;;  %v2736_v20 = vpop.f32.mrb[65].mxu1  ;;  %v3243_v41 = vstv %s3612_s27  ;;  %s4124_s27 = scalar_lea.vmem %s5970_s11, 16 }
 0x3b6   : > { %v3183_v7 = vand.u32 2147483647, %v3167_v60  ;;  %v3170_v24 = vadd.f32 %v5944_v17, %v2736_v20  ;;  %p4125_p11 = scmp.ne.s32.totalorder %s5970_s11, %s4124_s27 }
 0x3b7   : > { %v3184_v33 = vand.u32 2147483647, %v3168_v47  ;;  %v3185_v35 = vand.u32 2147483647, %v3169_v23 }
 0x3b8   : > { %v3201_v19 = vmul.f32 %v3200_v61, %v3183_v7  ;;  %v3186_v34 = vand.u32 2147483647, %v3170_v24  ;;  %v3247_v24 = vstv %s3613_s28  ;;  %p4126_p1 = pnand %p4125_p11, %p6088_p13  ;;  %s4128_s28 = sshll.u32 %s4205_s16, 4  ;;  %s4129_s28 = int_to_ptr.vmem [resolvable:$false] %s4128_s28 }
 0x3b9   : > { %v3204_v62 = vmul.f32 %v3203_v2, %v3184_v33  ;;  %v3208_v10 = vmul.f32 %v3207_v55, %v3185_v35  ;;  %p4131_p5 = scmp.lt.s32.totalorder %s5970_s11, %s4129_s28 }
 0x3ba   : > { %v3212_v51 = vmul.f32 %v3211_v9, %v3186_v34  ;;  %v3251_v34 = vstv %s3614_s24  ;;  %p4127_p6 = pneg %p4126_p1  ;;  %s4130_s24 = scalar_lea.vmem %s4129_s28, 32 }
 0x3bb   : > { %v3205_v32 = vadd.f32 %v3204_v62, %v3201_v19  ;;  %p4132_p9 = scmp.lt.s32.totalorder %s4130_s24, %s4124_s27 }
 0x3bd   : > { %v3209_v44 = vadd.f32 %v3208_v10, %v3205_v32  ;;  %p4133_p10 = por %p4132_p9, %p4131_p5 }
 0x3bf   : > { %v3213_v29 = vadd.f32 %v3212_v51, %v3209_v44  ;;  %p4134_p2 = pnand %p4133_p10, %p4127_p6 }
 0x3d2   : > { %v2805_v58 = vpop.f32.mrb[66].mxu0 }
 0x3d3   : > { %v3171_v36 = vadd.f32 %v5944_v17, %v2805_v58  ;;  %v2807_v54 = vpop.f32.mrb[67].mxu0 }
 0x3d4   : > { %v3172_v39 = vadd.f32 %v5944_v17, %v2807_v54 }
 0x3d5   : > { %v3187_v12 = vand.u32 2147483647, %v3171_v36  ;;  %v2876_v14 = vpop.f32.mrb[66].mxu1 }
 0x3d6   : > { %v3188_v59 = vand.u32 2147483647, %v3172_v39  ;;  %v3173_v63 = vadd.f32 %v5944_v17, %v2876_v14  ;;  %v2878_v11 = vpop.f32.mrb[67].mxu1 }
 0x3d7   : > { %v3216_v22 = vmul.f32 %v3215_v30, %v3187_v12  ;;  %v3174_v13 = vadd.f32 %v5944_v17, %v2878_v11  ;;  %v3259_v30 = vstv %s3616_s29 }
 0x3d8   : > { %v3220_v8 = vmul.f32 %v3219_v50, %v3188_v59  ;;  %v3189_v49 = vand.u32 2147483647, %v3173_v63  ;;  %v6087_v63 = vld [vmem:[#allocation11_spill] sm:$0xff] }
 0x3d9   : > { %v3217_v42 = vadd.f32 %v3216_v22, %v3213_v29  ;;  %v3190_v25 = vand.u32 2147483647, %v3174_v13  ;;  %v3255_v29 = vstv %s3615_s26  ;;  %v3269_v22 = vstv %s3265_s8 }
 0x3da   : > { %v3224_v37 = vmul.f32 %v3223_v21, %v3189_v49 }
 0x3db   : > { %v3221_v45 = vadd.f32 %v3220_v8, %v3217_v42  ;;  %v3228_v5 = vmul.f32 %v3227_v53, %v3190_v25 }
 0x3dd   : > { %v3225_v28 = vadd.f32 %v3224_v37, %v3221_v45 }
 0x3df   : > { %v3229_v46 = vadd.f32 %v3228_v5, %v3225_v28 }
 0x3e6   : > { %v2947_v15 = vpop.f32.mrb[68].mxu0 }
 0x3e7   : > { %v3175_v0 = vadd.f32 %v5944_v17, %v2947_v15  ;;  %v2949_v31 = vpop.f32.mrb[69].mxu0 }
 0x3e8   : > { %v3176_v56 = vadd.f32 %v5944_v17, %v2949_v31 }
 0x3e9   : > { %v3191_v38 = vand.u32 2147483647, %v3175_v0  ;;  %v3018_v57 = vpop.f32.mrb[68].mxu1 }
 0x3ea   : > { %v3177_v1 = vadd.f32 %v5944_v17, %v3018_v57  ;;  %v3192_v40 = vand.u32 2147483647, %v3176_v56  ;;  %v3020_v26 = vpop.f32.mrb[69].mxu1 }
 0x3eb   : > { %v3232_v3 = vmul.f32 %v3231_v48, %v3191_v38  ;;  %v3178_v27 = vadd.f32 %v5944_v17, %v3020_v26 }
 0x3ec   : > { %v3193_v16 = vand.u32 2147483647, %v3177_v1  ;;  %v3236_v6 = vmul.f32 %v3235_v43, %v3192_v40 }
 0x3ed   : > { %v3233_v18 = vadd.f32 %v3232_v3, %v3229_v46  ;;  %v3194_v60 = vand.u32 2147483647, %v3178_v27 }
 0x3ee   : > { %v3240_v61 = vmul.f32 %v3239_v4, %v3193_v16 }
 0x3ef   : > { %v3237_v47 = vadd.f32 %v3236_v6, %v3233_v18  ;;  %v3244_v7 = vmul.f32 %v3243_v41, %v3194_v60 }
 0x3f1   : > { %v3241_v52 = vadd.f32 %v3240_v61, %v3237_v47 }
 0x3f3   : > { %v3245_v2 = vadd.f32 %v3244_v7, %v3241_v52 }
 0x3f8   : > { %v3089_v23 = vpop.f32.mrb[70].mxu0 }
 0x3f9   : > { %v3179_v20 = vadd.f32 %v5944_v17, %v3089_v23  ;;  %v3160_v33 = vpop.f32.mrb[70].mxu1  ;;  %v3091_v55 = vpop.f32.mrb[71].mxu0 }
 0x3fa   : > { %v3181_v19 = vadd.f32 %v5944_v17, %v3160_v33  ;;  %v3180_v35 = vadd.f32 %v5944_v17, %v3091_v55  ;;  %v3162_v9 = vpop.f32.mrb[71].mxu1 }
 0x3fb   : > { %v3195_v62 = vand.u32 2147483647, %v3179_v20  ;;  %v3182_v10 = vadd.f32 %v5944_v17, %v3162_v9  ;;  %v3267_v17 = vstv %s3263_s7 }
 0x3fc   : > { %v3196_v32 = vand.u32 2147483647, %v3180_v35  ;;  %v3197_v44 = vand.u32 2147483647, %v3181_v19 }
 0x3fd   : > { %v3248_v51 = vmul.f32 %v3247_v24, %v3195_v62  ;;  %v3198_v54 = vand.u32 2147483647, %v3182_v10 }
 0x3fe   : > { %v3252_v58 = vmul.f32 %v3251_v34, %v3196_v32  ;;  %v3256_v39 = vmul.f32 %v3255_v29, %v3197_v44 }
 0x3ff   : > { %v3249_v36 = vadd.f32 %v3248_v51, %v3245_v2  ;;  %v3260_v14 = vmul.f32 %v3259_v30, %v3198_v54 }
 0x401   : > { %v3253_v12 = vadd.f32 %v3252_v58, %v3249_v36 }
 0x403   : > { %v3257_v50 = vadd.f32 %v3256_v39, %v3253_v12 }
 0x405   : > { %v3261_v59 = vadd.f32 %v3260_v14, %v3257_v50 }
 0x407   : > { %v3266_v11 = vmul.f32 %v6087_v63, %v3261_v59 }
 0x409   : > { %v3268_v21 = vmul.f32 %v3267_v17, %v3266_v11 }
 0x40b   : > { %v3270_v13 = vadd.f32 %v3269_v22, %v3268_v21 }
 0x40d   : > { %3271 = vst [vmem:[%s187_s10] sm:$0x1] %v3270_v13 }
 0x40e   : > { %4137 = shalt.err (!%p4134_p2)
}
 0x40f   : > { %s4138_s26 = scalar_lea.hbm %s5968_s20, 16  ;;  %s4142_s4 = scalar_lea.hbm %s6013_s3, 32 }
 0x410   : > { %p4139_p3 = scmp.ne.s32.totalorder %s5968_s20, %s4138_s26  ;;  %p4143_p7 = scmp.lt.u32.totalorder %s5968_s20, %s6013_s3 }
 0x411   : > { %p4144_p8 = scmp.lt.u32.totalorder %s4142_s4, %s4138_s26  ;;  %p4146_p11 = scmp.lt.u32.totalorder %s4138_s26, %s5968_s20 }
 0x412   : > { %p4140_p4 = pnand %p4139_p3, %p6088_p13 }
 0x413   : > { %p4145_p12 = por %p4144_p8, %p4143_p7 }
 0x414   : > { %p4141_p0 = pneg %p4140_p4 }
 0x415   : > { %p4147_p1 = por %p4146_p11, %p4145_p12 }
 0x417   : > { %p4148_p6 = pnand %p4147_p1, %p4141_p0 }
 0x419   : > { %4151 = shalt.err (!%p4148_p6)
}
 0x41a   : > { %3758 = dma.vmem_to_hbm [thread:$0]  (%p6088_p13), %s5970_s11, 16, %s5968_s20, %s3273_s25  }
 0x41b PF: > { %p3775_p5 = scmp.ge.s32.totalorder %s4194_s15, 2  ;;  %s3297_s7 = sand.u32 1, %s4182_s12  }
 0x41c   : > { %p6089_p9 = scmp.ne.s32.totalorder %s6034_s23, 0  ;;  %s3298_s8 = scalar_lea.sflag [#allocation4], %s3297_s7 }
 0x41e   : > { %p3768_p10 = pnand %p3775_p5, %p6089_p9 }
 0x420   : > { %4177 = dma.done.wait (!%p3768_p10), %s3298_s8, 16  }
 0x421   : > { %4179 = vsyncadd (!%p3768_p10), %s3298_s8, 4294967280  ;;  %p15_p2 = scmp.ge.s32.totalorder %s4251_s18, 4   ;;  %s6090_s12 = smov %s4186_s13 }
 0x422   : > { %s6091_s13 = smov %s4190_s14  ;;  %s6092_s14 = smov %s4262_s21 }
 0x423   : > { %s6093_s15 = smov %s4251_s18  ;;  %17 = sbr.rel (!%p15_p2) target bundleno = 5 (0x5), region = 77 }
 0x42a   :  { %3302 = vsyncpa [#allocation3], 1 }
 0x42b   :  { %3304 = vsyncpa [#allocation3 + $0x1], 1 }
 0x42c   :  { %3305 = vsyncpa [#allocation4], 1 }
 0x42d   :  { %3307 = vsyncpa [#allocation4 + $0x1], 1 }
 0x42e   :  { %3308 = vsyncpa [#allocation5], 1 }
 0x42f   :  { %3310 = vsyncpa [#allocation5 + $0x1], 1 }

</bundles_post_ra>
